<compile_context>
chip_gen: v5e
topology: v5e:2x2
jax: 0.10.0
libtpu: 0.0.40
codegen_flags: <defaults>
</compile_context>

<pallas_src>
import jax
import jax.numpy as jnp
from jax.experimental import pallas as pl
from jax.experimental.pallas import tpu as pltpu

BN_EPS = 1e-5
VMEM_LIMIT = 48 * 1024 * 1024     # explicit scoped-VMEM limit (fits v7x with headroom)
TILE_BUDGET = 8 * 1024 * 1024     # per-grid-step working-set budget for Ho tiling


def _round_up(v, m):
    return (v + m - 1) // m * m


def _pick_tile_h(n, ho, wo, wp, cp, kh, stride, *,
                 budget=TILE_BUDGET, min_steps=4):
    """Largest divisor of Ho whose per-step working set fits `budget`,
    preferring enough total grid steps (n * tiles) to feed both TensorCores
    and give the software pipeline some depth."""
    def lane_ok(th):
        # z output block is (th*wo, CP): second-minor dim must be a multiple of
        # 8 unless the block spans the whole array.
        return (th * wo) % 8 == 0 or th == ho

    def fits(th):
        span = (th - 1) * stride + kh
        need = (2 * span * wp * cp * 2      # x tile (bf16), double-buffered
                + 2 * th * wo * cp * 2      # z tile (bf16), double-buffered
                + th * wo * cp * 4)         # f32 accumulator value
        return need <= budget

    divisors = [t for t in range(1, ho + 1) if ho % t == 0 and lane_ok(t)]
    fitting = [t for t in divisors if fits(t)]
    if not fitting:
        return min(divisors)                # smallest legal tile; best effort
    good = [t for t in fitting if n * (ho // t) >= min_steps]
    return max(good) if good else max(fitting)


# ----------------------------------------------------------------------------
# Pass 1: depthwise conv (VPU shifted-slice MACs) + pointwise 1x1 conv (MXU)
#         + per-(image, row-tile) partial BN statistics.
# ----------------------------------------------------------------------------
def _make_conv_kernel(kh, kw, stride, th, wo, cp):
    def kernel(x_ref, wdw_ref, wpw_ref, z_ref, stats_ref):
        # x_ref: (span_h, Wp, Cp) bf16 | wdw_ref: (kh*kw, Cp) f32
        # wpw_ref: (Cp, Cp) bf16 | z_ref: (th*wo, Cp) bf16 | stats_ref: (2, Cp) f32
        wdw = wdw_ref[...]
        if stride == 1:
            # hoisted cast: one full-tile convert instead of one per tap
            xf = x_ref[...].astype(jnp.float32)
            taps = [xf[i:i + th, j:j + wo, :]
                    for i in range(kh) for j in range(kw)]
        else:
            # strided ref reads: only the needed elements are loaded per tap
            taps = [x_ref[pl.ds(i, th, stride=stride),
                          pl.ds(j, wo, stride=stride), :].astype(jnp.float32)
                    for i in range(kh) for j in range(kw)]
        # accumulator initialized with the first tap (no zeros + extra add)
        acc = taps[0] * wdw[0:1, :]
        for tap in range(1, kh * kw):
            acc = acc + taps[tap] * wdw[tap:tap + 1, :]

        # pointwise 1x1 conv == channel matmul (MXU, bf16 in / f32 accumulate)
        zdw = acc.reshape(th * wo, cp).astype(jnp.bfloat16)
        z = jnp.dot(zdw, wpw_ref[...], preferred_element_type=jnp.float32)

        # BN partials from the f32 accumulator, before the bf16 cast of z.
        stats_ref[0:1, :] = jnp.sum(z, axis=0, keepdims=True)
        stats_ref[1:2, :] = jnp.sum(z * z, axis=0, keepdims=True)
        z_ref[...] = z.astype(z_ref.dtype)

    return kernel


# ----------------------------------------------------------------------------
# Pass 2: folded BatchNorm (one FMA per element) + Hardswish, lane-dense tiles.
# ----------------------------------------------------------------------------
def _bn_act_kernel(z_ref, scale_ref, shift_ref, o_ref):
    y = z_ref[...].astype(jnp.float32) * scale_ref[...] + shift_ref[...]
    hsw = y * jnp.clip(y + 3.0, 0.0, 6.0) * (1.0 / 6.0)      # nn.Hardswish
    o_ref[...] = hsw.astype(o_ref.dtype)


def dwconv2d_bn(x_nchw, w_dw, w_pw, gamma, beta, *, stride=1):
    """Forward of DWConv2d_BN (training-mode BN).  x_nchw: (N, Cin, H, W) f32."""
    N, cin, H, W = x_nchw.shape
    cout = int(w_dw.shape[0])
    kh, kw = int(w_dw.shape[2]), int(w_dw.shape[3])
    pad = (kh - 1) // 2
    # TODO(synk): only the standard depthwise case (in_ch == out_ch, channel
    #             multiplier 1) is implemented.
    assert cin == cout, "DWConv2d_BN kernel requires in_ch == out_ch"
    C = cout
    CP = _round_up(max(C, 128), 128)              # lane-dense channel padding
    Ho = (H + 2 * pad - kh) // stride + 1
    Wo = (W + 2 * pad - kw) // stride + 1
    Hp, Wp = H + 2 * pad, W + 2 * pad
    HoWo = Ho * Wo

    # ---- glue: NCHW -> NHWC, zero-pad, bf16, Ho-tile halo materialization ----
    x = jnp.transpose(x_nchw, (0, 2, 3, 1)).astype(jnp.float32)
    x = jnp.pad(x, ((0, 0), (pad, pad), (pad, pad), (0, CP - C)))
    x = x.astype(jnp.bfloat16)

    TH = _pick_tile_h(N, Ho, Wo, Wp, CP, kh, stride)
    T = Ho // TH
    span_h = (TH - 1) * stride + kh
    rows = jnp.arange(T)[:, None] * (TH * stride) + jnp.arange(span_h)[None, :]
    x_tiles = x[:, rows]            # (N, T, span_h, Wp, CP); halo rows duplicated

    # depthwise weight (C,1,kh,kw) -> (kh*kw, CP): tap (i,j), channel in lanes
    wdw = jnp.transpose(w_dw[:, 0, :, :], (1, 2, 0)).reshape(kh * kw, C)
    wdw = jnp.pad(wdw, ((0, 0), (0, CP - C))).astype(jnp.float32)
    # pointwise weight (Cout,Cin,1,1) -> (Cin, Cout) matrix, padded, bf16
    wpw = jnp.pad(w_pw[:, :, 0, 0].T, ((0, CP - C), (0, CP - C)))
    wpw = wpw.astype(jnp.bfloat16)

    # ---- pass 1: conv + partial BN stats ------------------------------------
    conv_kernel = _make_conv_kernel(kh, kw, stride, TH, Wo, CP)
    z, stats = pl.pallas_call(
        conv_kernel,
        out_shape=(jax.ShapeDtypeStruct((N, HoWo, CP), jnp.bfloat16),
                   jax.ShapeDtypeStruct((N, T, 2, CP), jnp.float32)),
        grid=(N, T),
        in_specs=[
            pl.BlockSpec((None, None, span_h, Wp, CP),
                         lambda n, t: (n, t, 0, 0, 0)),
            pl.BlockSpec((kh * kw, CP), lambda n, t: (0, 0)),   # resident weights
            pl.BlockSpec((CP, CP), lambda n, t: (0, 0)),        # resident weights
        ],
        out_specs=(
            pl.BlockSpec((None, TH * Wo, CP), lambda n, t: (n, t, 0)),
            pl.BlockSpec((None, None, 2, CP), lambda n, t: (n, t, 0, 0)),
        ),
        compiler_params=pltpu.CompilerParams(
            dimension_semantics=("parallel", "parallel"),
            vmem_limit_bytes=VMEM_LIMIT),
    )(x_tiles, wdw, wpw)

    # ---- tiny cross-tile BN reduction + scale/shift folding (plain JAX) -----
    cnt = jnp.float32(N * HoWo)
    ch_sum = jnp.sum(stats[:, :, 0, :C], axis=(0, 1))
    ch_ssq = jnp.sum(stats[:, :, 1, :C], axis=(0, 1))
    mean = ch_sum / cnt
    # TODO(synk): E[z^2]-E[z]^2 can cancel when |mean| >> std; a shifted /
    #             Welford-style accumulation would be needed for training-grade
    #             statistics.
    var = jnp.maximum(ch_ssq / cnt - mean * mean, 0.0)       # biased training var
    inv = jax.lax.rsqrt(var + BN_EPS)
    scale = gamma.astype(jnp.float32) * inv
    shift = beta.astype(jnp.float32) - mean * scale
    scale_p = jnp.pad(scale, (0, CP - C)).reshape(1, CP)
    shift_p = jnp.pad(shift, (0, CP - C)).reshape(1, CP)

    # ---- pass 2: folded BN + Hardswish over the flattened row matrix --------
    R = N * HoWo
    TM = 512 if R >= 512 else R                   # lane-dense; cdiv masks the tail
    z2 = z.reshape(R, CP)
    out2 = pl.pallas_call(
        _bn_act_kernel,
        out_shape=jax.ShapeDtypeStruct((R, CP), jnp.float32),
        grid=(pl.cdiv(R, TM),),
        in_specs=[
            pl.BlockSpec((TM, CP), lambda t: (t, 0)),
            pl.BlockSpec((1, CP), lambda t: (0, 0)),
            pl.BlockSpec((1, CP), lambda t: (0, 0)),
        ],
        out_specs=pl.BlockSpec((TM, CP), lambda t: (t, 0)),
        compiler_params=pltpu.CompilerParams(
            dimension_semantics=("parallel",),
            vmem_limit_bytes=VMEM_LIMIT),
    )(z2, scale_p, shift_p)

    # ---- back to PyTorch NCHW f32, drop channel padding ----------------------
    out = out2.reshape(N, Ho, Wo, CP)[..., :C]
    return jnp.transpose(out, (0, 3, 1, 2))


def _reference(x_nchw, w_dw, w_pw, gamma, beta, *, stride=1):
    """Pure-JAX reference: depthwise conv -> 1x1 conv -> training BN -> Hardswish."""
    C = w_dw.shape[0]
    kh = w_dw.shape[2]
    pad = (kh - 1) // 2
    z = jax.lax.conv_general_dilated(
        x_nchw, w_dw, window_strides=(stride, stride),
        padding=[(pad, pad), (pad, pad)],
        dimension_numbers=("NCHW", "OIHW", "NCHW"),
        feature_group_count=C)
    z = jax.lax.conv_general_dilated(
        z, w_pw, window_strides=(1, 1), padding=[(0, 0), (0, 0)],
        dimension_numbers=("NCHW", "OIHW", "NCHW"))
    mean = jnp.mean(z, axis=(0, 2, 3), keepdims=True)
    var = jnp.mean(jnp.square(z - mean), axis=(0, 2, 3), keepdims=True)
    y = (gamma.reshape(1, -1, 1, 1) * (z - mean) * jax.lax.rsqrt(var + BN_EPS)
         + beta.reshape(1, -1, 1, 1))
    return y * jnp.clip(y + 3.0, 0.0, 6.0) / 6.0


if __name__ == "__main__":
    # Module config (synthetic, deterministic init): in_ch == out_ch depthwise
    in_ch = out_ch = 4
    ksize, stride = 3, 1
    bn_weight_init = 1.0

    key = jax.random.PRNGKey(0)
    kx, k1, k2 = jax.random.split(key, 3)

    # Input (PyTorch NCHW convention)
    x = jax.random.normal(kx, (2, in_ch, 16, 16), dtype=jnp.float32)

    # Conv weight init: normal(0, sqrt(2 / n)), n = kh*kw*out_channels
    n_dw = ksize * ksize * out_ch
    w_dw = (jax.random.normal(k1, (out_ch, 1, ksize, ksize), jnp.float32)
            * jnp.sqrt(2.0 / n_dw))                       # depthwise (groups=out_ch)
    n_pw = 1 * 1 * out_ch
    w_pw = (jax.random.normal(k2, (out_ch, out_ch, 1, 1), jnp.float32)
            * jnp.sqrt(2.0 / n_pw))                       # pointwise 1x1
    # BN params: weight = bn_weight_init, bias = 0
    gamma = jnp.full((out_ch,), bn_weight_init, dtype=jnp.float32)
    beta = jnp.zeros((out_ch,), dtype=jnp.float32)

    y = dwconv2d_bn(x, w_dw, w_pw, gamma, beta, stride=stride)
    y = jax.block_until_ready(y)

    y_ref = _reference(x, w_dw, w_pw, gamma, beta, stride=stride)
    assert y.shape == y_ref.shape == (2, out_ch, 16, 16)
    max_err = jnp.max(jnp.abs(y - y_ref))
    # bf16 activations / bf16 MXU operands / bf16 z -> loosened tolerance
    assert jnp.allclose(y, y_ref, rtol=2e-2, atol=2e-2), (
        f"mismatch vs reference, max|diff|={max_err}")

    print("KERNEL_OK")
</pallas_src>

<mosaic_0001>
module attributes {stable_mosaic.version = 11 : i64} {
  func.func @kernel(%arg0: i32, %arg1: i32, %arg2: memref<1x1x10x18x128xbf16, #tpu.memory_space<vmem>>, %arg3: memref<9x128xf32, #tpu.memory_space<vmem>>, %arg4: memref<128x128xbf16, #tpu.memory_space<vmem>>, %arg5: memref<1x128x128xbf16, #tpu.memory_space<vmem>>, %arg6: memref<1x1x2x128xf32, #tpu.memory_space<vmem>>) attributes {dimension_semantics = [#tpu.dimension_semantics<parallel>, #tpu.dimension_semantics<parallel>], iteration_bounds = array<i64: 2, 2>, scalar_prefetch = 0 : i64, scratch_operands = 0 : i64, tpu.core_type = #tpu.core_type<tc>, window_params = [{transform_indices = @transform_0, window_bounds = array<i64: 1, 1, 10, 18, 128>}, {pipeline_mode = #tpu.pipeline_mode<synchronous>, transform_indices = @transform_1, window_bounds = array<i64: 9, 128>}, {pipeline_mode = #tpu.pipeline_mode<synchronous>, transform_indices = @transform_2, window_bounds = array<i64: 128, 128>}, {transform_indices = @transform_3, window_bounds = array<i64: 1, 128, 128>}, {transform_indices = @transform_4, window_bounds = array<i64: 1, 1, 2, 128>}]} {
    %c0 = arith.constant 0 : index
    %c0_0 = arith.constant 0 : index
    %0 = vector.load %arg3[%c0, %c0_0] : memref<9x128xf32, #tpu.memory_space<vmem>>, vector<9x128xf32>
    %c0_1 = arith.constant 0 : index
    %c0_2 = arith.constant 0 : index
    %c0_3 = arith.constant 0 : index
    %c0_4 = arith.constant 0 : index
    %c0_5 = arith.constant 0 : index
    %1 = vector.load %arg2[%c0_1, %c0_2, %c0_3, %c0_4, %c0_5] : memref<1x1x10x18x128xbf16, #tpu.memory_space<vmem>>, vector<1x1x10x18x128xbf16>
    %2 = vector.shape_cast %1 : vector<1x1x10x18x128xbf16> to vector<10x18x128xbf16>
    %3 = arith.extf %2 : vector<10x18x128xbf16> to vector<10x18x128xf32>
    %4 = vector.extract_strided_slice %3 {offsets = [0, 0, 0], sizes = [8, 16, 128], strides = [1, 1, 1]} : vector<10x18x128xf32> to vector<8x16x128xf32>
    %5 = vector.extract_strided_slice %3 {offsets = [0, 1, 0], sizes = [8, 16, 128], strides = [1, 1, 1]} : vector<10x18x128xf32> to vector<8x16x128xf32>
    %6 = vector.extract_strided_slice %3 {offsets = [0, 2, 0], sizes = [8, 16, 128], strides = [1, 1, 1]} : vector<10x18x128xf32> to vector<8x16x128xf32>
    %7 = vector.extract_strided_slice %3 {offsets = [1, 0, 0], sizes = [8, 16, 128], strides = [1, 1, 1]} : vector<10x18x128xf32> to vector<8x16x128xf32>
    %8 = vector.extract_strided_slice %3 {offsets = [1, 1, 0], sizes = [8, 16, 128], strides = [1, 1, 1]} : vector<10x18x128xf32> to vector<8x16x128xf32>
    %9 = vector.extract_strided_slice %3 {offsets = [1, 2, 0], sizes = [8, 16, 128], strides = [1, 1, 1]} : vector<10x18x128xf32> to vector<8x16x128xf32>
    %10 = vector.extract_strided_slice %3 {offsets = [2, 0, 0], sizes = [8, 16, 128], strides = [1, 1, 1]} : vector<10x18x128xf32> to vector<8x16x128xf32>
    %11 = vector.extract_strided_slice %3 {offsets = [2, 1, 0], sizes = [8, 16, 128], strides = [1, 1, 1]} : vector<10x18x128xf32> to vector<8x16x128xf32>
    %12 = vector.extract_strided_slice %3 {offsets = [2, 2, 0], sizes = [8, 16, 128], strides = [1, 1, 1]} : vector<10x18x128xf32> to vector<8x16x128xf32>
    %13 = vector.extract_strided_slice %0 {offsets = [0, 0], sizes = [1, 128], strides = [1, 1]} : vector<9x128xf32> to vector<1x128xf32>
    %14 = vector.shape_cast %13 : vector<1x128xf32> to vector<1x1x128xf32>
    %15 = vector.broadcast %14 : vector<1x1x128xf32> to vector<8x16x128xf32>
    %16 = arith.mulf %4, %15 : vector<8x16x128xf32>
    %17 = vector.extract_strided_slice %0 {offsets = [1, 0], sizes = [1, 128], strides = [1, 1]} : vector<9x128xf32> to vector<1x128xf32>
    %18 = vector.shape_cast %17 : vector<1x128xf32> to vector<1x1x128xf32>
    %19 = vector.broadcast %18 : vector<1x1x128xf32> to vector<8x16x128xf32>
    %20 = arith.mulf %5, %19 : vector<8x16x128xf32>
    %21 = arith.addf %16, %20 : vector<8x16x128xf32>
    %22 = vector.extract_strided_slice %0 {offsets = [2, 0], sizes = [1, 128], strides = [1, 1]} : vector<9x128xf32> to vector<1x128xf32>
    %23 = vector.shape_cast %22 : vector<1x128xf32> to vector<1x1x128xf32>
    %24 = vector.broadcast %23 : vector<1x1x128xf32> to vector<8x16x128xf32>
    %25 = arith.mulf %6, %24 : vector<8x16x128xf32>
    %26 = arith.addf %21, %25 : vector<8x16x128xf32>
    %27 = vector.extract_strided_slice %0 {offsets = [3, 0], sizes = [1, 128], strides = [1, 1]} : vector<9x128xf32> to vector<1x128xf32>
    %28 = vector.shape_cast %27 : vector<1x128xf32> to vector<1x1x128xf32>
    %29 = vector.broadcast %28 : vector<1x1x128xf32> to vector<8x16x128xf32>
    %30 = arith.mulf %7, %29 : vector<8x16x128xf32>
    %31 = arith.addf %26, %30 : vector<8x16x128xf32>
    %32 = vector.extract_strided_slice %0 {offsets = [4, 0], sizes = [1, 128], strides = [1, 1]} : vector<9x128xf32> to vector<1x128xf32>
    %33 = vector.shape_cast %32 : vector<1x128xf32> to vector<1x1x128xf32>
    %34 = vector.broadcast %33 : vector<1x1x128xf32> to vector<8x16x128xf32>
    %35 = arith.mulf %8, %34 : vector<8x16x128xf32>
    %36 = arith.addf %31, %35 : vector<8x16x128xf32>
    %37 = vector.extract_strided_slice %0 {offsets = [5, 0], sizes = [1, 128], strides = [1, 1]} : vector<9x128xf32> to vector<1x128xf32>
    %38 = vector.shape_cast %37 : vector<1x128xf32> to vector<1x1x128xf32>
    %39 = vector.broadcast %38 : vector<1x1x128xf32> to vector<8x16x128xf32>
    %40 = arith.mulf %9, %39 : vector<8x16x128xf32>
    %41 = arith.addf %36, %40 : vector<8x16x128xf32>
    %42 = vector.extract_strided_slice %0 {offsets = [6, 0], sizes = [1, 128], strides = [1, 1]} : vector<9x128xf32> to vector<1x128xf32>
    %43 = vector.shape_cast %42 : vector<1x128xf32> to vector<1x1x128xf32>
    %44 = vector.broadcast %43 : vector<1x1x128xf32> to vector<8x16x128xf32>
    %45 = arith.mulf %10, %44 : vector<8x16x128xf32>
    %46 = arith.addf %41, %45 : vector<8x16x128xf32>
    %47 = vector.extract_strided_slice %0 {offsets = [7, 0], sizes = [1, 128], strides = [1, 1]} : vector<9x128xf32> to vector<1x128xf32>
    %48 = vector.shape_cast %47 : vector<1x128xf32> to vector<1x1x128xf32>
    %49 = vector.broadcast %48 : vector<1x1x128xf32> to vector<8x16x128xf32>
    %50 = arith.mulf %11, %49 : vector<8x16x128xf32>
    %51 = arith.addf %46, %50 : vector<8x16x128xf32>
    %52 = vector.extract_strided_slice %0 {offsets = [8, 0], sizes = [1, 128], strides = [1, 1]} : vector<9x128xf32> to vector<1x128xf32>
    %53 = vector.shape_cast %52 : vector<1x128xf32> to vector<1x1x128xf32>
    %54 = vector.broadcast %53 : vector<1x1x128xf32> to vector<8x16x128xf32>
    %55 = arith.mulf %12, %54 : vector<8x16x128xf32>
    %56 = arith.addf %51, %55 : vector<8x16x128xf32>
    %57 = vector.shape_cast %56 : vector<8x16x128xf32> to vector<128x128xf32>
    %58 = arith.truncf %57 : vector<128x128xf32> to vector<128x128xbf16>
    %c0_6 = arith.constant 0 : index
    %c0_7 = arith.constant 0 : index
    %59 = vector.load %arg4[%c0_6, %c0_7] : memref<128x128xbf16, #tpu.memory_space<vmem>>, vector<128x128xbf16>
    %cst = arith.constant dense<0.000000e+00> : vector<128x128xf32>
    %60 = tpu.matmul %58, %59, %cst {dimension_numbers = #tpu.dot_dimension_numbers<[1], [0], [0], [1], [0, 0, 1, 1], [], []>} : vector<128x128xbf16>, vector<128x128xbf16>, vector<128x128xf32> -> vector<128x128xf32>
    %cst_8 = arith.constant dense<0.000000e+00> : vector<128xf32>
    %61 = vector.multi_reduction <add>, %60, %cst_8 [0] : vector<128x128xf32> to vector<128xf32>
    %62 = vector.shape_cast %61 : vector<128xf32> to vector<1x128xf32>
    %c0_9 = arith.constant 0 : index
    %c0_10 = arith.constant 0 : index
    %c0_11 = arith.constant 0 : index
    %c0_12 = arith.constant 0 : index
    %63 = vector.load %arg6[%c0_9, %c0_10, %c0_11, %c0_12] : memref<1x1x2x128xf32, #tpu.memory_space<vmem>>, vector<1x1x1x128xf32>
    %64 = vector.shape_cast %63 : vector<1x1x1x128xf32> to vector<1x128xf32>
    %65 = vector.shape_cast %62 : vector<1x128xf32> to vector<1x1x1x128xf32>
    tpu.vector_store %arg6[%c0_9, %c0_10, %c0_11, %c0_12], %65 {strides = array<i32>} : memref<1x1x2x128xf32, #tpu.memory_space<vmem>>, vector<1x1x1x128xf32>,
    %66 = arith.mulf %60, %60 : vector<128x128xf32>
    %cst_13 = arith.constant dense<0.000000e+00> : vector<128xf32>
    %67 = vector.multi_reduction <add>, %66, %cst_13 [0] : vector<128x128xf32> to vector<128xf32>
    %68 = vector.shape_cast %67 : vector<128xf32> to vector<1x128xf32>
    %c0_14 = arith.constant 0 : index
    %c0_15 = arith.constant 0 : index
    %c1 = arith.constant 1 : index
    %c0_16 = arith.constant 0 : index
    %69 = vector.load %arg6[%c0_14, %c0_15, %c1, %c0_16] : memref<1x1x2x128xf32, #tpu.memory_space<vmem>>, vector<1x1x1x128xf32>
    %70 = vector.shape_cast %69 : vector<1x1x1x128xf32> to vector<1x128xf32>
    %71 = vector.shape_cast %68 : vector<1x128xf32> to vector<1x1x1x128xf32>
    tpu.vector_store %arg6[%c0_14, %c0_15, %c1, %c0_16], %71 {strides = array<i32>} : memref<1x1x2x128xf32, #tpu.memory_space<vmem>>, vector<1x1x1x128xf32>,
    %72 = arith.truncf %60 : vector<128x128xf32> to vector<128x128xbf16>
    %c0_17 = arith.constant 0 : index
    %c0_18 = arith.constant 0 : index
    %c0_19 = arith.constant 0 : index
    %73 = vector.load %arg5[%c0_17, %c0_18, %c0_19] : memref<1x128x128xbf16, #tpu.memory_space<vmem>>, vector<1x128x128xbf16>
    %74 = vector.shape_cast %73 : vector<1x128x128xbf16> to vector<128x128xbf16>
    %75 = vector.shape_cast %72 : vector<128x128xbf16> to vector<1x128x128xbf16>
    tpu.vector_store %arg5[%c0_17, %c0_18, %c0_19], %75 {strides = array<i32>} : memref<1x128x128xbf16, #tpu.memory_space<vmem>>, vector<1x128x128xbf16>,
    return
  }
  func.func @transform_0(%arg0: i32, %arg1: i32) -> (i32, i32, i32, i32, i32) {
    %c0_i32 = arith.constant 0 : i32
    %c0_i32_0 = arith.constant 0 : i32
    %c0_i32_1 = arith.constant 0 : i32
    %c0_i32_2 = arith.constant 0 : i32
    return %arg0, %arg1, %c0_i32, %c0_i32_0, %c0_i32_1 : i32, i32, i32, i32, i32
  }
  func.func @transform_1(%arg0: i32, %arg1: i32) -> (i32, i32) {
    %c0_i32 = arith.constant 0 : i32
    %c0_i32_0 = arith.constant 0 : i32
    %c0_i32_1 = arith.constant 0 : i32
    return %c0_i32, %c0_i32_0 : i32, i32
  }
  func.func @transform_2(%arg0: i32, %arg1: i32) -> (i32, i32) {
    %c0_i32 = arith.constant 0 : i32
    %c0_i32_0 = arith.constant 0 : i32
    %c0_i32_1 = arith.constant 0 : i32
    return %c0_i32, %c0_i32_0 : i32, i32
  }
  func.func @transform_3(%arg0: i32, %arg1: i32) -> (i32, i32, i32) {
    %c0_i32 = arith.constant 0 : i32
    %c0_i32_0 = arith.constant 0 : i32
    return %arg0, %arg1, %c0_i32 : i32, i32, i32
  }
  func.func @transform_4(%arg0: i32, %arg1: i32) -> (i32, i32, i32, i32) {
    %c0_i32 = arith.constant 0 : i32
    %c0_i32_0 = arith.constant 0 : i32
    %c0_i32_1 = arith.constant 0 : i32
    return %arg0, %arg1, %c0_i32, %c0_i32_0 : i32, i32, i32, i32
  }
}

</mosaic_0001>

<bundles_post_ra>
// kernel: tpu_custom_call.1
= control target key start
LH: loop header
LB: loop body
LE: loop exit
PB: predicated region body
PF: predicated region fallthrough
CT: control target
= control target key end

     0   :  { %10 = vsyncpa [#allocation3], 0  ;;  %s2628_s0 = inlined_call_operand.vmem [shape: bf16[2,2,10,18,128], index: 0, kind: input, shape index: {}]   ;;  %s2629_s1 = inlined_call_operand.vmem [shape: f32[9,128], index: 1, kind: input, shape index: {}]   ;;  %s2630_s2 = inlined_call_operand.vmem [shape: bf16[128,128], index: 2, kind: input, shape index: {}]   ;;  %s2631_s3 = inlined_call_operand.hbm [shape: bf16[2,256,128], index: 3, kind: output, shape index: {0}]   ;;  %s2632_s4 = inlined_call_operand.hbm [shape: f32[2,2,2,128], index: 4, kind: output, shape index: {1}]  }
   0x1   :  { %12 = vsyncpa [#allocation3 + $0x1], 0 }
   0x2   :  { %13 = vsyncpa [#allocation5], 0 }
   0x3   :  { %15 = vsyncpa [#allocation5 + $0x1], 0  ;;  %s1872_s15 = smov 0   ;;  %s1874_s16 = smov 0  }
   0x4   :  { %s1876_s17 = smov 0   ;;  %s1878_s18 = smov 0  }
   0x5   :  { %s1880_s19 = smov 0   ;;  %s1882_s20 = smov 0  }
   0x6   :  { %s1884_s21 = smov 0   ;;  %s1886_s22 = smov 0  }
   0x7 LB: > { %s1483_s23 = sadd.s32 4294967295, %s1843_s22   ;;  %s1484_s24 = sadd.s32 4294967294, %s1843_s22   ;;  %s1843_s22 = sphi %s1886_s22, %s21_s22   ;;  %s1839_s21 = sphi %s1884_s21, %s2641_s21   ;;  %s1835_s20 = sphi %s1882_s20, %s2640_s20   ;;  %s1831_s19 = sphi %s1880_s19, %s2639_s19   ;;  %s1827_s18 = sphi %s1878_s18, %s2638_s18   ;;  %s1823_s17 = sphi %s1876_s17, %s2637_s17   ;;  %s1819_s16 = sphi %s1874_s16, %s2636_s16   ;;  %s1815_s15 = sphi %s1872_s15, %s2635_s15  }
   0x8   : > { %s30_s25 = sadd.s32 1, %s1835_s20  ;;  %s33_s26 = sadd.s32 1, %s1839_s21 }
   0x9   : > { %p31_p0 = scmp.ge.s32.totalorder %s30_s25, 2  ;;  %p122_p1 = scmp.ne.s32.totalorder %s1823_s17, %s1819_s16 }
   0xa   : > { %p123_p2 = scmp.eq.s32.totalorder %s1483_s23, 3  ;;  %p128_p5 = scmp.ne.s32.totalorder %s1819_s16, %s1815_s15 }
   0xb   : > { %s2643_s25 = smov (%p31_p0, %s30_s25), 0  ;;  %s2645_s26 = smov (!%p31_p0, %s33_s26), %s1839_s21 }
   0xc   : > { %s108_s27 = ssub.s32 %s1835_s20, %s2643_s25  ;;  %p1923_p3 = por %p123_p2, %p122_p1 }
   0xd   : > { %p35_p4 = scmp.ge.s32.totalorder %s2645_s26, 2  ;;  %p129_p6 = scmp.eq.s32.totalorder %s1484_s24, 3 }
   0xe   : > { %p1487_p7 = scmp.ge.s32.totalorder %s1843_s22, 1  ;;  %p193_p9 = scmp.lt.s32.totalorder %s1843_s22, 5 }
   0xf   : > { %s2647_s26 = smov (%p35_p4, %s2645_s26), 0  ;;  %p1932_p8 = por %p129_p6, %p128_p5 }
  0x10   : > { %s107_s30 = ssub.s32 %s1839_s21, %s2647_s26  ;;  %s112_s5 = sadd.s32 1, %s1823_s17 }
  0x11   : > { %s109_s6 = sor.u32 %s108_s27, %s107_s30  ;;  %p194_p10 = pnand %p1487_p7, %p193_p9 }
  0x12   : > { %p110_p11 = scmp.eq.s32.totalorder %s109_s6, 0  ;;  %p228_p12 = scmp.lt.s32.totalorder (!%p194_p10), %s1831_s19, 1 }
  0x13   : > { %197 = sbr.rel (%p194_p10) target bundleno = 349 (0x15d), region = 32  ;;  %p230_p13 = scmp.lt.s32.totalorder (!%p194_p10), %s1827_s18, 1 }
  0x14   : > { %s1941_s7 = scalar_select %p110_p11, %s1823_s17, %s112_s5  }
  0x15   : > { %s1525_s24 = sshll.u32 (!%p194_p10), %s1827_s18, 4  ;;  %s1526_s27 = sshll.u32 (!%p194_p10), %s1831_s19, 5 }
  0x16   : > { %s1341_s30 = sadd.s32 (!%p194_p10), %s1526_s27, %s1525_s24 }
  0x17   : > { %s1527_s5 = sshll.u32 (!%p194_p10), %s1341_s30, 2 }
  0x18   : > { %v1539_v0 = vld [vmem:[%s2630_s2 + $0x38] sm:$0xff]  ;;  %v1538_v1 = vld [vmem:[%s2630_s2 + $0x30] sm:$0xff]  ;;  %s229_s12 = scalar_select %p228_p12, %s1831_s19, 1  ;;  %v238_v2 = vld [vmem:[%s2629_s1] sm:$0xff]  ;;  %vm366_vm0 = vcmask 1046528   ;;  %vm488_vm1 = vcmask 1045504  }
  0x19   : > { %1183 = vmatpush.bf16.msra.mxu0 %v1539_v0  ;;  %1611 = vmatpush.bf16.msra.mxu1 %v1539_v0  ;;  %s231_s13 = scalar_select %p230_p13, %s1827_s18, 1  ;;  %v1537_v3 = vld [vmem:[%s2630_s2 + $0x28] sm:$0xff]  ;;  %v1959_v4 = vperm.slane %v238_v2, 0  ;;  %v1961_v5 = vperm.slane %v238_v2, 1  ;;  %v1536_v6 = vld [vmem:[%s2630_s2 + $0x20] sm:$0xff]  ;;  %v1971_v7 = vperm.slane %v238_v2, 2 }
  0x1a   : > { %1612 = vmatpush.bf16.msra.mxu2 %v1539_v0  ;;  %1613 = vmatpush.bf16.msra.mxu3 %v1539_v0  ;;  %s1636_s14 = smul.u32 60, %s229_s12  ;;  %v1973_v8 = vperm.slane %v238_v2, 3  ;;  %v1975_v9 = vperm.slane %v238_v2, 4  ;;  %v1977_v10 = vperm.slane %v238_v2, 5  ;;  %v1982_v14 = vperm.slane %v238_v2, 6  ;;  %v1535_v32 = vld [vmem:[%s2630_s2 + $0x18] sm:$0xff]  ;;  %s1343_s9 = scalar_lea.hbm %s2631_s3, %s1527_s5 }
  0x1b   : > { %s1635_s23 = smul.u32 30, %s231_s13  ;;  %v1984_v15 = vperm.slane %v238_v2, 7  ;;  %v1534_v49 = vld [vmem:[%s2630_s2 + $0x10] sm:$0xff]  ;;  %v1533_v2 = vld [vmem:[%s2630_s2 + $0x8] sm:$0xff]  ;;  %s1346_s11 = sshll.u32 %s1343_s9, 4  ;;  %s1347_s11 = int_to_ptr.hbm [resolvable:$true] %s1346_s11 }
  0x1c   : > { %s1528_s12 = sshll.u32 %s1831_s19, 1  ;;  %s1731_s27 = sshra.s32 %s1347_s11, 4  ;;  %s1732_s27 = int_to_ptr.hbm [resolvable:$true] %s1731_s27 }
  0x1d   : > { %1184 = vmatpush.bf16.msra.mxu0 %v1538_v1  ;;  %1614 = vmatpush.bf16.msra.mxu1 %v1538_v1  ;;  %s234_s6 = sadd.s32 %s1636_s14, %s1635_s23  ;;  %s1733_s30 = scalar_lea.hbm %s1732_s27, 64 }
  0x1e   : > { %1615 = vmatpush.bf16.msra.mxu2 %v1538_v1  ;;  %1616 = vmatpush.bf16.msra.mxu3 %v1538_v1  ;;  %s1490_s8 = sshll.u32 %s234_s6, 2  ;;  %p1734_p0 = scmp.ne.s32.totalorder %s1732_s27, %s1733_s30 }
  0x1f   : > { %s1969_s13 = scalar_lea.vmem %s2628_s0, %s1490_s8  ;;  %s1737_s19 = scalar_lea.hbm %s2631_s3, 256 }
  0x20   : > { %v1541_v11 = vld [vmem:[%s1969_s13] sm:$0xff]   ;;  %v242_v12 = vld [vmem:[%s1969_s13 + $0x8] sm:$0x1]  ;;  %v243_v13 = vld [vmem:[%s1969_s13 + $0xc] sm:$0xff]   ;;  %p1735_p1 = pnand %p1734_p0, %p1923_p3  ;;  %p1738_p4 = scmp.lt.s32.totalorder %s1732_s27, %s2631_s3 }
  0x21   : > { %1185 = vmatpush.bf16.msra.mxu0 %v1537_v3  ;;  %1617 = vmatpush.bf16.msra.mxu1 %v1537_v3  ;;  %v1542_v16 = vunpack.c.l.bf16 %v1541_v11  ;;  %v1543_v17 = vunpack.c.h.bf16 %v1541_v11  ;;  %v245_v18 = vld [vmem:[%s1969_s13 + $0x14] sm:$0x1]  ;;  %v1600_v19 = vld [vmem:[%s1969_s13 + $0x18] sm:$0xff]   ;;  %v248_v20 = vld [vmem:[%s1969_s13 + $0x20] sm:$0x1]  ;;  %v272_v21 = vunpack.c.l.bf16 %v242_v12  ;;  %v1989_v22 = vunpack.c.l.bf16 %v243_v13  ;;  %p1739_p5 = scmp.lt.s32.totalorder %s1737_s19, %s1733_s30 }
  0x22   : > { %1618 = vmatpush.bf16.msra.mxu2 %v1537_v3  ;;  %1619 = vmatpush.bf16.msra.mxu3 %v1537_v3  ;;  %v1991_v23 = vunpack.c.l.bf16 %v1600_v19  ;;  %v1993_v24 = vunpack.c.h.bf16 %v1600_v19  ;;  %v1995_v25 = vunpack.c.h.bf16 %v243_v13  ;;  %v1997_v26 = vunpack.c.l.bf16 %v245_v18  ;;  %v1601_v27 = vld [vmem:[%s1969_s13 + $0x30] sm:$0xff]   ;;  %v2050_v13 = vld [vmem:[%s2629_s1 + $0x8] ss:$0 sm:$0xff]  ;;  %p1736_p2 = pneg %p1735_p1 }
  0x23   : > { %v2000_v28 = vunpack.c.l.bf16 %v248_v20  ;;  %v301_v29 = vmul.f32 %v1542_v16, %v1959_v4  ;;  %v302_v30 = vmul.f32 %v1543_v17, %v1959_v4  ;;  %v318_v31 = vmul.f32 %v1542_v16, %v1961_v5  ;;  %p1740_p6 = por %p1739_p5, %p1738_p4 }
  0x24   : > { %v319_v33 = vmul.f32 %v1543_v17, %v1961_v5  ;;  %v320_v34 = vmul.f32 %v1961_v5, %v272_v21  ;;  %v440_v35 = vmul.f32 %v1542_v16, %v1971_v7  ;;  %v2011_v36 = vunpack.c.l.bf16 %v1601_v27 }
  0x25   : > { %1186 = vmatpush.bf16.msra.mxu0 %v1536_v6  ;;  %1620 = vmatpush.bf16.msra.mxu1 %v1536_v6  ;;  %v367_v37 = vrot.slane %v318_v31, 1  ;;  %v441_v38 = vmul.f32 %v1543_v17, %v1971_v7  ;;  %v442_v39 = vmul.f32 %v1971_v7, %v272_v21  ;;  %v562_v40 = vmul.f32 %v1973_v8, %v1989_v22  ;;  %p1741_p7 = pnand %p1740_p6, %p1736_p2 }
  0x26   : > { %1621 = vmatpush.bf16.msra.mxu2 %v1536_v6  ;;  %1622 = vmatpush.bf16.msra.mxu3 %v1536_v6  ;;  %v368_v41 = vrot.slane %v319_v33, 1  ;;  %v370_v42 = vrot.slane %v320_v34, 1  ;;  %v489_v43 = vrot.slane %v440_v35, 2  ;;  %v563_v44 = vmul.f32 %v1973_v8, %v1995_v25  ;;  %v249_v34 = vld [vmem:[%s1969_s13 + $0x24] sm:$0xff]  }
  0x27   : > { %v490_v45 = vrot.slane %v441_v38, 2  ;;  %v492_v46 = vrot.slane %v442_v39, 2  ;;  %v595_v47 = vmul.f32 %v1975_v9, %v1989_v22  ;;  %v596_v48 = vmul.f32 %v1975_v9, %v1995_v25  ;;  %v1532_v35 = vld [vmem:[%s2630_s2] sm:$0xff] }
  0x28   : > { %v369_v50 = vsel %vm366_vm0, %v367_v37, %v368_v41  ;;  %v371_v51 = vsel %vm366_vm0, %v368_v41, %v370_v42  ;;  %v597_v52 = vmul.f32 %v1975_v9, %v1997_v26  ;;  %v2030_v53 = vunpack.c.h.bf16 %v1601_v27 }
  0x29   : > { %1187 = vmatpush.bf16.msra.mxu0 %v1535_v32  ;;  %1623 = vmatpush.bf16.msra.mxu1 %v1535_v32  ;;  %v423_v54 = vadd.f32 %v369_v50, %v301_v29  ;;  %v424_v55 = vadd.f32 %v371_v51, %v302_v30  ;;  %v491_v56 = vsel %vm488_vm1, %v489_v43, %v490_v45  ;;  %v643_v57 = vrot.slane %v595_v47, 1 }
  0x2a   : > { %1624 = vmatpush.bf16.msra.mxu2 %v1535_v32  ;;  %1625 = vmatpush.bf16.msra.mxu3 %v1535_v32  ;;  %v493_v58 = vsel %vm488_vm1, %v490_v45, %v492_v46  ;;  %v644_v59 = vrot.slane %v596_v48, 1  ;;  %v646_v60 = vrot.slane %v597_v52, 1  ;;  %v716_v61 = vmul.f32 %v1977_v10, %v1989_v22  ;;  %v251_v45 = vld [vmem:[%s1969_s13 + $0x2c] sm:$0x1]  ;;  %v254_v46 = vld [vmem:[%s1969_s13 + $0x38] sm:$0x1] }
  0x2b   : > { %v545_v62 = vadd.f32 %v491_v56, %v423_v54  ;;  %v546_v63 = vadd.f32 %v493_v58, %v424_v55  ;;  %v717_v0 = vmul.f32 %v1977_v10, %v1995_v25  ;;  %v718_v1 = vmul.f32 %v1977_v10, %v1997_v26 }
  0x2c   : > { %v645_v3 = vsel %vm366_vm0, %v643_v57, %v644_v59  ;;  %v647_v6 = vsel %vm366_vm0, %v644_v59, %v646_v60  ;;  %v764_v11 = vrot.slane %v716_v61, 2  ;;  %v837_v12 = vmul.f32 %v1991_v23, %v1982_v14 }
  0x2d   : > { %1188 = vmatpush.bf16.msra.mxu0 %v1534_v49  ;;  %1626 = vmatpush.bf16.msra.mxu1 %v1534_v49  ;;  %v578_v16 = vadd.f32 %v562_v40, %v545_v62  ;;  %v579_v17 = vadd.f32 %v563_v44, %v546_v63  ;;  %v765_v18 = vrot.slane %v717_v0, 2  ;;  %v767_v19 = vrot.slane %v718_v1, 2 }
  0x2e   : > { %1627 = vmatpush.bf16.msra.mxu2 %v1534_v49  ;;  %1628 = vmatpush.bf16.msra.mxu3 %v1534_v49  ;;  %v838_v20 = vmul.f32 %v1993_v24, %v1982_v14  ;;  %v870_v21 = vmul.f32 %v1991_v23, %v1984_v15  ;;  %v871_v27 = vmul.f32 %v1993_v24, %v1984_v15  ;;  %v2076_v50 = vunpack.c.l.bf16 %v249_v34 }
  0x2f   : > { %v872_v29 = vmul.f32 %v1984_v15, %v2000_v28  ;;  %v699_v30 = vadd.f32 %v645_v3, %v578_v16  ;;  %v700_v31 = vadd.f32 %v647_v6, %v579_v17  ;;  %v766_v32 = vsel %vm488_vm1, %v764_v11, %v765_v18 }
  0x30   : > { %v768_v33 = vsel %vm488_vm1, %v765_v18, %v767_v19  ;;  %v918_v37 = vrot.slane %v870_v21, 1  ;;  %v919_v38 = vrot.slane %v871_v27, 1  ;;  %v991_v40 = vmul.f32 %v2050_v13, %v1991_v23 }
  0x31   : > { %1189 = vmatpush.bf16.msra.mxu0 %v1533_v2  ;;  %1629 = vmatpush.bf16.msra.mxu1 %v1533_v2  ;;  %v921_v39 = vrot.slane %v872_v29, 1  ;;  %v820_v41 = vadd.f32 %v766_v32, %v699_v30  ;;  %v821_v42 = vadd.f32 %v768_v33, %v700_v31  ;;  %v992_v43 = vmul.f32 %v2050_v13, %v1993_v24 }
  0x32   : > { %1630 = vmatpush.bf16.msra.mxu2 %v1533_v2  ;;  %v993_v44 = vmul.f32 %v2050_v13, %v2000_v28  ;;  %v920_v47 = vsel %vm366_vm0, %v918_v37, %v919_v38  ;;  %v1039_v49 = vrot.slane %v991_v40, 2  ;;  %1631 = vmatpush.bf16.msra.mxu3 %v1533_v2  ;;  %v2078_v56 = vunpack.c.h.bf16 %v249_v34 }
  0x33   : > { %v922_v48 = vsel %vm366_vm0, %v919_v38, %v921_v39  ;;  %v853_v51 = vadd.f32 %v837_v12, %v820_v41  ;;  %v854_v52 = vadd.f32 %v838_v20, %v821_v42  ;;  %v1040_v54 = vrot.slane %v992_v43, 2 }
  0x34   : > { %v1042_v55 = vrot.slane %v993_v44, 2  ;;  %v2080_v57 = vunpack.c.l.bf16 %v251_v45  ;;  %v2082_v58 = vunpack.c.l.bf16 %v254_v46  ;;  %v305_v59 = vmul.f32 %v1991_v23, %v1959_v4 }
  0x35   : > { %1190 = vmatpush.bf16.msra.mxu0 %v1532_v35  ;;  %1632 = vmatpush.bf16.msra.mxu1 %v1532_v35  ;;  %v974_v60 = vadd.f32 %v920_v47, %v853_v51  ;;  %v975_v61 = vadd.f32 %v922_v48, %v854_v52  ;;  %v1041_v62 = vsel %vm488_vm1, %v1039_v49, %v1040_v54 }
  0x36   : > { %1633 = vmatpush.bf16.msra.mxu2 %v1532_v35  ;;  %v1043_v63 = vsel %vm488_vm1, %v1040_v54, %v1042_v55  ;;  %v306_v0 = vmul.f32 %v1993_v24, %v1959_v4  ;;  %v324_v1 = vmul.f32 %v1991_v23, %v1961_v5  ;;  %v325_v2 = vmul.f32 %v1993_v24, %v1961_v5 }
  0x37   : > { %v326_v3 = vmul.f32 %v1961_v5, %v2000_v28  ;;  %1634 = vmatpush.bf16.msra.mxu3 %v1532_v35  ;;  %v1095_v6 = vadd.f32 %v1041_v62, %v974_v60  ;;  %v1096_v11 = vadd.f32 %v1043_v63, %v975_v61  ;;  %v446_v12 = vmul.f32 %v1991_v23, %v1971_v7 }
  0x38   : > { %v447_v16 = vmul.f32 %v1993_v24, %v1971_v7  ;;  %v377_v17 = vrot.slane %v324_v1, 1  ;;  %v378_v18 = vrot.slane %v325_v2, 1  ;;  %v448_v20 = vmul.f32 %v1971_v7, %v2000_v28 }
  0x39   : > { %v380_v19 = vrot.slane %v326_v3, 1  ;;  %v1111_v21 = vpack.c.bf16 %v1096_v11, %v1095_v6  ;;  %v499_v27 = vrot.slane %v446_v12, 2  ;;  %v566_v30 = vmul.f32 %v1973_v8, %v2076_v50 }
  0x3a   : > { %v500_v29 = vrot.slane %v447_v16, 2  ;;  %v379_v31 = vsel %vm366_vm0, %v377_v17, %v378_v18  ;;  %v502_v33 = vrot.slane %v448_v20, 2  ;;  %v567_v34 = vmul.f32 %v1973_v8, %v2078_v56 }
  0x3b   : > { %v381_v32 = vsel %vm366_vm0, %v378_v18, %v380_v19  ;;  %1191 = vmatmul.bf16.vlgmr.msra.gmra.mxu0 %v1111_v21  ;;  %v427_v35 = vadd.f32 %v379_v31, %v305_v59  ;;  %v601_v39 = vmul.f32 %v1975_v9, %v2076_v50  ;;  %v602_v41 = vmul.f32 %v1975_v9, %v2078_v56  ;;  %v1602_v18 = vld [vmem:[%s1969_s13 + $0x48] sm:$0xff]  }
  0x3c   : > { %v428_v37 = vadd.f32 %v381_v32, %v306_v0  ;;  %v501_v38 = vsel %vm488_vm1, %v499_v27, %v500_v29  ;;  %v503_v40 = vsel %vm488_vm1, %v500_v29, %v502_v33  ;;  %v603_v42 = vmul.f32 %v1975_v9, %v2080_v57  ;;  %v255_v33 = vld [vmem:[%s1969_s13 + $0x3c] sm:$0xff]  }
  0x3d   : > { %v722_v43 = vmul.f32 %v1977_v10, %v2076_v50  ;;  %v549_v44 = vadd.f32 %v501_v38, %v427_v35  ;;  %v653_v46 = vrot.slane %v601_v39, 1  ;;  %v723_v47 = vmul.f32 %v1977_v10, %v2078_v56  ;;  %v257_v38 = vld [vmem:[%s1969_s13 + $0x44] sm:$0x1] }
  0x3e   : > { %v550_v45 = vadd.f32 %v503_v40, %v428_v37  ;;  %v654_v48 = vrot.slane %v602_v41, 1  ;;  %v656_v49 = vrot.slane %v603_v42, 1  ;;  %v724_v51 = vmul.f32 %v1977_v10, %v2080_v57  ;;  %v260_v40 = vld [vmem:[%s1969_s13 + $0x50] sm:$0x1] }
  0x3f   : > { %v774_v52 = vrot.slane %v722_v43, 2  ;;  %v582_v54 = vadd.f32 %v566_v30, %v549_v44  ;;  %v775_v59 = vrot.slane %v723_v47, 2  ;;  %v841_v60 = vmul.f32 %v2011_v36, %v1982_v14 }
  0x40   : > { %v583_v55 = vadd.f32 %v567_v34, %v550_v45  ;;  %v655_v61 = vsel %vm366_vm0, %v653_v46, %v654_v48  ;;  %v657_v62 = vsel %vm366_vm0, %v654_v48, %v656_v49  ;;  %v777_v63 = vrot.slane %v724_v51, 2 }
  0x41   : > { %v842_v0 = vmul.f32 %v2030_v53, %v1982_v14  ;;  %v703_v1 = vadd.f32 %v655_v61, %v582_v54  ;;  %v776_v3 = vsel %vm488_vm1, %v774_v52, %v775_v59  ;;  %v876_v6 = vmul.f32 %v2011_v36, %v1984_v15 }
  0x42   : > { %v704_v2 = vadd.f32 %v657_v62, %v583_v55  ;;  %v778_v11 = vsel %vm488_vm1, %v775_v59, %v777_v63  ;;  %v877_v12 = vmul.f32 %v2030_v53, %v1984_v15  ;;  %v878_v16 = vmul.f32 %v1984_v15, %v2082_v58 }
  0x43   : > { %v997_v17 = vmul.f32 %v2050_v13, %v2011_v36  ;;  %v824_v19 = vadd.f32 %v776_v3, %v703_v1  ;;  %v928_v21 = vrot.slane %v876_v6, 1  ;;  %v998_v27 = vmul.f32 %v2050_v13, %v2030_v53 }
  0x44   : > { %v825_v20 = vadd.f32 %v778_v11, %v704_v2  ;;  %v929_v29 = vrot.slane %v877_v12, 1  ;;  %v931_v30 = vrot.slane %v878_v16, 1  ;;  %v999_v31 = vmul.f32 %v2050_v13, %v2082_v58 }
  0x45   : > { %v1049_v32 = vrot.slane %v997_v17, 2  ;;  %v857_v34 = vadd.f32 %v841_v60, %v824_v19  ;;  %v1050_v37 = vrot.slane %v998_v27, 2  ;;  %v2145_v39 = vunpack.c.l.bf16 %v1602_v18 }
  0x46   : > { %v858_v35 = vadd.f32 %v842_v0, %v825_v20  ;;  %v930_v41 = vsel %vm366_vm0, %v928_v21, %v929_v29  ;;  %v932_v42 = vsel %vm366_vm0, %v929_v29, %v931_v30  ;;  %v1052_v43 = vrot.slane %v999_v31, 2 }
  0x47   : > { %v2150_v44 = vunpack.c.h.bf16 %v1602_v18  ;;  %v978_v45 = vadd.f32 %v930_v41, %v857_v34  ;;  %v1051_v47 = vsel %vm488_vm1, %v1049_v32, %v1050_v37  ;;  %v2153_v48 = vunpack.c.l.bf16 %v255_v33 }
  0x48   : > { %v979_v46 = vadd.f32 %v932_v42, %v858_v35  ;;  %v1053_v49 = vsel %vm488_vm1, %v1050_v37, %v1052_v43  ;;  %v2156_v51 = vunpack.c.h.bf16 %v255_v33  ;;  %v2158_v52 = vunpack.c.l.bf16 %v257_v38 }
  0x49   : > { %v2160_v54 = vunpack.c.l.bf16 %v260_v40  ;;  %v1099_v55 = vadd.f32 %v1051_v47, %v978_v45  ;;  %v309_v60 = vmul.f32 %v2011_v36, %v1959_v4  ;;  %v310_v61 = vmul.f32 %v2030_v53, %v1959_v4 }
  0x4a   : > { %v1100_v59 = vadd.f32 %v1053_v49, %v979_v46  ;;  %v330_v62 = vmul.f32 %v2011_v36, %v1961_v5  ;;  %v331_v63 = vmul.f32 %v2030_v53, %v1961_v5  ;;  %v332_v0 = vmul.f32 %v1961_v5, %v2082_v58 }
  0x4b   : > { %v452_v1 = vmul.f32 %v2011_v36, %v1971_v7  ;;  %v453_v3 = vmul.f32 %v2030_v53, %v1971_v7  ;;  %v454_v6 = vmul.f32 %v1971_v7, %v2082_v58  ;;  %v570_v11 = vmul.f32 %v1973_v8, %v2153_v48 }
  0x4c   : > { %v1113_v2 = vpack.c.bf16 %v1100_v59, %v1099_v55  ;;  %v387_v12 = vrot.slane %v330_v62, 1  ;;  %v388_v16 = vrot.slane %v331_v63, 1  ;;  %v390_v17 = vrot.slane %v332_v0, 1 }
  0x4d   : > { %v509_v18 = vrot.slane %v452_v1, 2  ;;  %v510_v19 = vrot.slane %v453_v3, 2  ;;  %v512_v20 = vrot.slane %v454_v6, 2  ;;  %v571_v21 = vmul.f32 %v1973_v8, %v2156_v51 }
  0x4e   : > { %1201 = vmatmul.bf16.vlgmr.msra.gmra.mxu1 %v1113_v2  ;;  %v607_v27 = vmul.f32 %v1975_v9, %v2153_v48  ;;  %v389_v29 = vsel %vm366_vm0, %v387_v12, %v388_v16  ;;  %v391_v30 = vsel %vm366_vm0, %v388_v16, %v390_v17  ;;  %v608_v31 = vmul.f32 %v1975_v9, %v2156_v51 }
  0x4f   : > { %v609_v32 = vmul.f32 %v1975_v9, %v2158_v52  ;;  %v431_v33 = vadd.f32 %v389_v29, %v309_v60  ;;  %v432_v34 = vadd.f32 %v391_v30, %v310_v61  ;;  %v511_v35 = vsel %vm488_vm1, %v509_v18, %v510_v19  ;;  %v1603_v18 = vld [vmem:[%s1969_s13 + $0x60] sm:$0xff]  }
  0x50   : > { %v513_v37 = vsel %vm488_vm1, %v510_v19, %v512_v20  ;;  %v663_v38 = vrot.slane %v607_v27, 1  ;;  %v664_v40 = vrot.slane %v608_v31, 1  ;;  %v728_v42 = vmul.f32 %v1977_v10, %v2153_v48 }
  0x51   : > { %v666_v41 = vrot.slane %v609_v32, 1  ;;  %v553_v43 = vadd.f32 %v511_v35, %v431_v33  ;;  %v554_v45 = vadd.f32 %v513_v37, %v432_v34  ;;  %v729_v46 = vmul.f32 %v1977_v10, %v2156_v51  ;;  %v261_v33 = vld [vmem:[%s1969_s13 + $0x54] sm:$0xff]   ;;  %v263_v34 = vld [vmem:[%s1969_s13 + $0x5c] sm:$0x1] }
  0x52   : > { %v730_v47 = vmul.f32 %v1977_v10, %v2158_v52  ;;  %v665_v49 = vsel %vm366_vm0, %v663_v38, %v664_v40  ;;  %v784_v59 = vrot.slane %v728_v42, 2  ;;  %v845_v60 = vmul.f32 %v2145_v39, %v1982_v14 }
  0x53   : > { %v667_v55 = vsel %vm366_vm0, %v664_v40, %v666_v41  ;;  %v586_v61 = vadd.f32 %v570_v11, %v553_v43  ;;  %v587_v62 = vadd.f32 %v571_v21, %v554_v45  ;;  %v785_v63 = vrot.slane %v729_v46, 2  ;;  %v266_v46 = vld [vmem:[%s1969_s13 + $0x68] sm:$0x1] }
  0x54   : > { %v787_v0 = vrot.slane %v730_v47, 2  ;;  %v846_v1 = vmul.f32 %v2150_v44, %v1982_v14  ;;  %v882_v2 = vmul.f32 %v2145_v39, %v1984_v15  ;;  %v883_v3 = vmul.f32 %v2150_v44, %v1984_v15 }
  0x55   : > { %v884_v6 = vmul.f32 %v1984_v15, %v2160_v54  ;;  %v707_v12 = vadd.f32 %v665_v49, %v586_v61  ;;  %v708_v16 = vadd.f32 %v667_v55, %v587_v62  ;;  %v786_v11 = vsel %vm488_vm1, %v784_v59, %v785_v63 }
  0x56   : > { %v788_v17 = vsel %vm488_vm1, %v785_v63, %v787_v0  ;;  %v938_v19 = vrot.slane %v882_v2, 1  ;;  %v939_v20 = vrot.slane %v883_v3, 1  ;;  %v1003_v27 = vmul.f32 %v2050_v13, %v2145_v39 }
  0x57   : > { %v941_v21 = vrot.slane %v884_v6, 1  ;;  %v828_v29 = vadd.f32 %v786_v11, %v707_v12  ;;  %v829_v30 = vadd.f32 %v788_v17, %v708_v16  ;;  %v1004_v31 = vmul.f32 %v2050_v13, %v2150_v44 }
  0x58   : > { %v1005_v32 = vmul.f32 %v2050_v13, %v2160_v54  ;;  %v940_v35 = vsel %vm366_vm0, %v938_v19, %v939_v20  ;;  %v1059_v38 = vrot.slane %v1003_v27, 2  ;;  %v2223_v40 = vunpack.c.l.bf16 %v1603_v18 }
  0x59   : > { %v942_v37 = vsel %vm366_vm0, %v939_v20, %v941_v21  ;;  %v861_v41 = vadd.f32 %v845_v60, %v828_v29  ;;  %v862_v42 = vadd.f32 %v846_v1, %v829_v30  ;;  %v1060_v43 = vrot.slane %v1004_v31, 2 }
  0x5a   : > { %v1062_v45 = vrot.slane %v1005_v32, 2  ;;  %v2226_v47 = vunpack.c.h.bf16 %v1603_v18  ;;  %v2228_v49 = vunpack.c.l.bf16 %v261_v33  ;;  %v2230_v55 = vunpack.c.h.bf16 %v261_v33 }
  0x5b   : > { %v2232_v59 = vunpack.c.l.bf16 %v263_v34  ;;  %v982_v61 = vadd.f32 %v940_v35, %v861_v41  ;;  %v983_v62 = vadd.f32 %v942_v37, %v862_v42  ;;  %v1061_v63 = vsel %vm488_vm1, %v1059_v38, %v1060_v43 }
  0x5c   : > { %v1063_v0 = vsel %vm488_vm1, %v1060_v43, %v1062_v45  ;;  %v2236_v2 = vunpack.c.l.bf16 %v266_v46  ;;  %v313_v60 = vmul.f32 %v2145_v39, %v1959_v4  ;;  %v314_v1 = vmul.f32 %v2150_v44, %v1959_v4 }
  0x5d   : > { %v336_v3 = vmul.f32 %v2145_v39, %v1961_v5  ;;  %v1103_v6 = vadd.f32 %v1061_v63, %v982_v61  ;;  %v1104_v12 = vadd.f32 %v1063_v0, %v983_v62  ;;  %v337_v16 = vmul.f32 %v2150_v44, %v1961_v5 }
  0x5e   : > { %v338_v11 = vmul.f32 %v1961_v5, %v2160_v54  ;;  %v458_v18 = vmul.f32 %v2145_v39, %v1971_v7  ;;  %v459_v19 = vmul.f32 %v2150_v44, %v1971_v7  ;;  %v460_v20 = vmul.f32 %v1971_v7, %v2160_v54 }
  0x5f   : > { %v397_v17 = vrot.slane %v336_v3, 1  ;;  %v1115_v21 = vpack.c.bf16 %v1104_v12, %v1103_v6  ;;  %v398_v27 = vrot.slane %v337_v16, 1  ;;  %v574_v30 = vmul.f32 %v1973_v8, %v2228_v49 }
  0x60   : > { %v400_v29 = vrot.slane %v338_v11, 1  ;;  %v519_v31 = vrot.slane %v458_v18, 2  ;;  %v520_v32 = vrot.slane %v459_v19, 2  ;;  %v522_v33 = vrot.slane %v460_v20, 2 }
  0x61   : > { %v575_v34 = vmul.f32 %v1973_v8, %v2230_v55  ;;  %1211 = vmatmul.bf16.vlgmr.msra.gmra.mxu2 %v1115_v21  ;;  %v399_v35 = vsel %vm366_vm0, %v397_v17, %v398_v27  ;;  %v613_v38 = vmul.f32 %v1975_v9, %v2228_v49  ;;  %v614_v41 = vmul.f32 %v1975_v9, %v2230_v55 }
  0x62   : > { %v401_v37 = vsel %vm366_vm0, %v398_v27, %v400_v29  ;;  %v435_v42 = vadd.f32 %v399_v35, %v313_v60  ;;  %v521_v45 = vsel %vm488_vm1, %v519_v31, %v520_v32  ;;  %v523_v46 = vsel %vm488_vm1, %v520_v32, %v522_v33 }
  0x63   : > { %v436_v43 = vadd.f32 %v401_v37, %v314_v1  ;;  %v615_v61 = vmul.f32 %v1975_v9, %v2232_v59  ;;  %v673_v62 = vrot.slane %v613_v38, 1  ;;  %v674_v63 = vrot.slane %v614_v41, 1 }
  0x64   : > { %v734_v0 = vmul.f32 %v1977_v10, %v2228_v49  ;;  %v557_v3 = vadd.f32 %v521_v45, %v435_v42  ;;  %v735_v12 = vmul.f32 %v1977_v10, %v2230_v55  ;;  %v736_v60 = vmul.f32 %v1977_v10, %v2232_v59 }
  0x65   : > { %v558_v6 = vadd.f32 %v523_v46, %v436_v43  ;;  %v675_v1 = vsel %vm366_vm0, %v673_v62, %v674_v63  ;;  %v676_v16 = vrot.slane %v615_v61, 1  ;;  %v849_v17 = vmul.f32 %v2223_v40, %v1982_v14 }
  0x66   : > { %v794_v11 = vrot.slane %v734_v0, 2  ;;  %v590_v18 = vadd.f32 %v574_v30, %v557_v3  ;;  %v795_v20 = vrot.slane %v735_v12, 2  ;;  %v797_v21 = vrot.slane %v736_v60, 2 }
  0x67   : > { %v591_v19 = vadd.f32 %v575_v34, %v558_v6  ;;  %v677_v27 = vsel %vm366_vm0, %v674_v63, %v676_v16  ;;  %v850_v29 = vmul.f32 %v2226_v47, %v1982_v14  ;;  %v888_v31 = vmul.f32 %v2223_v40, %v1984_v15 }
  0x68   : > { %v889_v32 = vmul.f32 %v2226_v47, %v1984_v15  ;;  %v711_v33 = vadd.f32 %v675_v1, %v590_v18  ;;  %v796_v37 = vsel %vm488_vm1, %v794_v11, %v795_v20  ;;  %v798_v30 = vsel %vm488_vm1, %v795_v20, %v797_v21 }
  0x69   : > { %v712_v35 = vadd.f32 %v677_v27, %v591_v19  ;;  %v890_v34 = vmul.f32 %v1984_v15, %v2236_v2  ;;  %v948_v38 = vrot.slane %v888_v31, 1  ;;  %v1009_v42 = vmul.f32 %v2050_v13, %v2223_v40 }
  0x6a   : > { %v949_v41 = vrot.slane %v889_v32, 1  ;;  %v832_v43 = vadd.f32 %v796_v37, %v711_v33  ;;  %v1010_v46 = vmul.f32 %v2050_v13, %v2226_v47  ;;  %v1011_v61 = vmul.f32 %v2050_v13, %v2236_v2 }
  0x6b   : > { %v833_v45 = vadd.f32 %v798_v30, %v712_v35  ;;  %v951_v63 = vrot.slane %v890_v34, 1  ;;  %v1069_v0 = vrot.slane %v1009_v42, 2  ;;  %v303_v3 = vmul.f32 %v1959_v4, %v1989_v22 }
  0x6c   : > { %v950_v62 = vsel %vm366_vm0, %v948_v38, %v949_v41  ;;  %v865_v6 = vadd.f32 %v849_v17, %v832_v43  ;;  %v1070_v60 = vrot.slane %v1010_v46, 2  ;;  %v1072_v1 = vrot.slane %v1011_v61, 2 }
  0x6d   : > { %v866_v12 = vadd.f32 %v850_v29, %v833_v45  ;;  %v952_v16 = vsel %vm366_vm0, %v949_v41, %v951_v63  ;;  %v304_v11 = vmul.f32 %v1959_v4, %v1995_v25  ;;  %v321_v18 = vmul.f32 %v1961_v5, %v1989_v22 }
  0x6e   : > { %v322_v19 = vmul.f32 %v1961_v5, %v1995_v25  ;;  %v986_v20 = vadd.f32 %v950_v62, %v865_v6  ;;  %v1071_v27 = vsel %vm488_vm1, %v1069_v0, %v1070_v60  ;;  %v1073_v17 = vsel %vm488_vm1, %v1070_v60, %v1072_v1 }
  0x6f   : > { %v987_v21 = vadd.f32 %v952_v16, %v866_v12  ;;  %v323_v29 = vmul.f32 %v1961_v5, %v1997_v26  ;;  %v372_v31 = vrot.slane %v321_v18, 1  ;;  %v443_v33 = vmul.f32 %v1971_v7, %v1989_v22 }
  0x70   : > { %v373_v32 = vrot.slane %v322_v19, 1  ;;  %v1107_v35 = vadd.f32 %v1071_v27, %v986_v20  ;;  %v444_v30 = vmul.f32 %v1971_v7, %v1995_v25  ;;  %v445_v34 = vmul.f32 %v1971_v7, %v1997_v26 }
  0x71   : > { %v1108_v37 = vadd.f32 %v1073_v17, %v987_v21  ;;  %v375_v41 = vrot.slane %v323_v29, 1  ;;  %v494_v42 = vrot.slane %v443_v33, 2  ;;  %v564_v43 = vmul.f32 %v1991_v23, %v1973_v8 }
  0x72   : > { %v374_v38 = vsel %vm366_vm0, %v372_v31, %v373_v32  ;;  %v495_v61 = vrot.slane %v444_v30, 2  ;;  %v497_v62 = vrot.slane %v445_v34, 2  ;;  %v565_v63 = vmul.f32 %v1993_v24, %v1973_v8 }
  0x73   : > { %v1117_v45 = vpack.c.bf16 %v1108_v37, %v1107_v35  ;;  %v425_v46 = vadd.f32 %v374_v38, %v303_v3  ;;  %v376_v22 = vsel %vm366_vm0, %v373_v32, %v375_v41  ;;  %v598_v25 = vmul.f32 %v1991_v23, %v1975_v9 }
  0x74   : > { %v599_v26 = vmul.f32 %v1993_v24, %v1975_v9  ;;  %v426_v0 = vadd.f32 %v376_v22, %v304_v11  ;;  %v496_v6 = vsel %vm488_vm1, %v494_v42, %v495_v61  ;;  %v498_v12 = vsel %vm488_vm1, %v495_v61, %v497_v62 }
  0x75   : > { %1221 = vmatmul.bf16.vlgmr.msra.gmra.mxu3 %v1117_v45  ;;  %v600_v3 = vmul.f32 %v1975_v9, %v2000_v28  ;;  %v547_v60 = vadd.f32 %v496_v6, %v425_v46  ;;  %v648_v1 = vrot.slane %v598_v25, 1  ;;  %v719_v18 = vmul.f32 %v1991_v23, %v1977_v10 }
  0x76   : > { %v649_v16 = vrot.slane %v599_v26, 1  ;;  %v548_v19 = vadd.f32 %v498_v12, %v426_v0  ;;  %v720_v21 = vmul.f32 %v1993_v24, %v1977_v10  ;;  %v721_v11 = vmul.f32 %v1977_v10, %v2000_v28 }
  0x77   : > { %v651_v20 = vrot.slane %v600_v3, 1  ;;  %v580_v27 = vadd.f32 %v564_v43, %v547_v60  ;;  %v769_v29 = vrot.slane %v719_v18, 2  ;;  %v839_v31 = vmul.f32 %v1982_v14, %v2076_v50 }
  0x78   : > { %v650_v17 = vsel %vm366_vm0, %v648_v1, %v649_v16  ;;  %v581_v32 = vadd.f32 %v565_v63, %v548_v19  ;;  %v770_v35 = vrot.slane %v720_v21, 2  ;;  %v772_v23 = vrot.slane %v721_v11, 2 }
  0x79   : > { %v652_v33 = vsel %vm366_vm0, %v649_v16, %v651_v20  ;;  %v701_v37 = vadd.f32 %v650_v17, %v580_v27  ;;  %v840_v30 = vmul.f32 %v1982_v14, %v2078_v56  ;;  %v873_v24 = vmul.f32 %v1984_v15, %v2076_v50 }
  0x7a   : > { %v874_v28 = vmul.f32 %v1984_v15, %v2078_v56  ;;  %v702_v34 = vadd.f32 %v652_v33, %v581_v32  ;;  %v771_v38 = vsel %vm488_vm1, %v769_v29, %v770_v35  ;;  %v773_v41 = vsel %vm488_vm1, %v770_v35, %v772_v23 }
  0x7b   : > { %v875_v42 = vmul.f32 %v1984_v15, %v2080_v57  ;;  %v822_v43 = vadd.f32 %v771_v38, %v701_v37  ;;  %v923_v45 = vrot.slane %v873_v24, 1  ;;  %v994_v61 = vmul.f32 %v2050_v13, %v2076_v50 }
  0x7c   : > { %v924_v46 = vrot.slane %v874_v28, 1  ;;  %v823_v62 = vadd.f32 %v773_v41, %v702_v34  ;;  %v995_v63 = vmul.f32 %v2050_v13, %v2078_v56  ;;  %v996_v25 = vmul.f32 %v2050_v13, %v2080_v57 }
  0x7d   : > { %v926_v22 = vrot.slane %v875_v42, 1  ;;  %v855_v26 = vadd.f32 %v839_v31, %v822_v43  ;;  %v1044_v6 = vrot.slane %v994_v61, 2  ;;  %v307_v12 = vmul.f32 %v1959_v4, %v2076_v50 }
  0x7e   : > { %v925_v0 = vsel %vm366_vm0, %v923_v45, %v924_v46  ;;  %v856_v3 = vadd.f32 %v840_v30, %v823_v62  ;;  %v1045_v1 = vrot.slane %v995_v63, 2  ;;  %v1047_v16 = vrot.slane %v996_v25, 2 }
  0x7f   : > { %v927_v60 = vsel %vm366_vm0, %v924_v46, %v926_v22  ;;  %v976_v18 = vadd.f32 %v925_v0, %v855_v26  ;;  %v308_v19 = vmul.f32 %v1959_v4, %v2078_v56  ;;  %v327_v20 = vmul.f32 %v1961_v5, %v2076_v50 }
  0x80   : > { %v328_v21 = vmul.f32 %v1961_v5, %v2078_v56  ;;  %v977_v11 = vadd.f32 %v927_v60, %v856_v3  ;;  %v1046_v27 = vsel %vm488_vm1, %v1044_v6, %v1045_v1  ;;  %v1048_v17 = vsel %vm488_vm1, %v1045_v1, %v1047_v16 }
  0x81   : > { %v329_v29 = vmul.f32 %v1961_v5, %v2080_v57  ;;  %v1097_v31 = vadd.f32 %v1046_v27, %v976_v18  ;;  %v382_v32 = vrot.slane %v327_v20, 1  ;;  %v449_v35 = vmul.f32 %v1971_v7, %v2076_v50 }
  0x82   : > { %v383_v33 = vrot.slane %v328_v21, 1  ;;  %v1098_v23 = vadd.f32 %v1048_v17, %v977_v11  ;;  %v450_v30 = vmul.f32 %v1971_v7, %v2078_v56  ;;  %v451_v24 = vmul.f32 %v1971_v7, %v2080_v57 }
  0x83   : > { %v385_v37 = vrot.slane %v329_v29, 1  ;;  %v504_v34 = vrot.slane %v449_v35, 2  ;;  %v568_v38 = vmul.f32 %v2011_v36, %v1973_v8  ;;  %v569_v41 = vmul.f32 %v2030_v53, %v1973_v8 }
  0x84   : > { %v384_v28 = vsel %vm366_vm0, %v382_v32, %v383_v33  ;;  %v1112_v42 = vpack.c.bf16 %v1098_v23, %v1097_v31  ;;  %v505_v45 = vrot.slane %v450_v30, 2  ;;  %v507_v61 = vrot.slane %v451_v24, 2 }
  0x85   : > { %v386_v50 = vsel %vm366_vm0, %v383_v33, %v385_v37  ;;  %v429_v43 = vadd.f32 %v384_v28, %v307_v12  ;;  %v604_v56 = vmul.f32 %v2011_v36, %v1975_v9  ;;  %v605_v57 = vmul.f32 %v2030_v53, %v1975_v9 }
  0x86   : > { %v430_v46 = vadd.f32 %v386_v50, %v308_v19  ;;  %1196 = vmatmul.bf16.gmra.mxu0 %v1112_v42  ;;  %v506_v62 = vsel %vm488_vm1, %v504_v34, %v505_v45  ;;  %v606_v22 = vmul.f32 %v1975_v9, %v2082_v58  ;;  %v725_v63 = vmul.f32 %v2011_v36, %v1977_v10 }
  0x87   : > { %v726_v25 = vmul.f32 %v2030_v53, %v1977_v10  ;;  %v508_v26 = vsel %vm488_vm1, %v505_v45, %v507_v61  ;;  %v551_v0 = vadd.f32 %v506_v62, %v429_v43  ;;  %v658_v6 = vrot.slane %v604_v56, 1 }
  0x88   : > { %v659_v12 = vrot.slane %v605_v57, 1  ;;  %v552_v3 = vadd.f32 %v508_v26, %v430_v46  ;;  %v661_v60 = vrot.slane %v606_v22, 1  ;;  %v727_v1 = vmul.f32 %v1977_v10, %v2082_v58 }
  0x89   : > { %v779_v16 = vrot.slane %v725_v63, 2  ;;  %v584_v18 = vadd.f32 %v568_v38, %v551_v0  ;;  %v780_v20 = vrot.slane %v726_v25, 2  ;;  %v843_v36 = vmul.f32 %v1982_v14, %v2153_v48 }
  0x8a   : > { %v660_v19 = vsel %vm366_vm0, %v658_v6, %v659_v12  ;;  %v585_v21 = vadd.f32 %v569_v41, %v552_v3  ;;  %v662_v53 = vsel %vm366_vm0, %v659_v12, %v661_v60  ;;  %v782_v11 = vrot.slane %v727_v1, 2 }
  0x8b   : > { %v844_v27 = vmul.f32 %v1982_v14, %v2156_v51  ;;  %v705_v17 = vadd.f32 %v660_v19, %v584_v18  ;;  %v781_v29 = vsel %vm488_vm1, %v779_v16, %v780_v20  ;;  %v879_v58 = vmul.f32 %v1984_v15, %v2153_v48 }
  0x8c   : > { %v880_v31 = vmul.f32 %v1984_v15, %v2156_v51  ;;  %v706_v32 = vadd.f32 %v662_v53, %v585_v21  ;;  %v783_v33 = vsel %vm488_vm1, %v780_v20, %v782_v11  ;;  %v881_v35 = vmul.f32 %v1984_v15, %v2158_v52 }
  0x8d   : > { %v1000_v23 = vmul.f32 %v2050_v13, %v2153_v48  ;;  %v826_v37 = vadd.f32 %v781_v29, %v705_v17  ;;  %v933_v30 = vrot.slane %v879_v58, 1  ;;  %v1001_v28 = vmul.f32 %v2050_v13, %v2156_v51 }
  0x8e   : > { %v934_v24 = vrot.slane %v880_v31, 1  ;;  %v827_v34 = vadd.f32 %v783_v33, %v706_v32  ;;  %v936_v38 = vrot.slane %v881_v35, 1  ;;  %v1002_v41 = vmul.f32 %v2050_v13, %v2158_v52 }
  0x8f   : > { %v1054_v42 = vrot.slane %v1000_v23, 2  ;;  %v859_v50 = vadd.f32 %v843_v36, %v826_v37  ;;  %v1055_v45 = vrot.slane %v1001_v28, 2  ;;  %v311_v46 = vmul.f32 %v1959_v4, %v2153_v48 }
  0x90   : > { %v935_v43 = vsel %vm366_vm0, %v933_v30, %v934_v24  ;;  %v860_v61 = vadd.f32 %v844_v27, %v827_v34  ;;  %v937_v56 = vsel %vm366_vm0, %v934_v24, %v936_v38  ;;  %v1057_v57 = vrot.slane %v1002_v41, 2 }
  0x91   : > { %v312_v62 = vmul.f32 %v1959_v4, %v2156_v51  ;;  %v980_v22 = vadd.f32 %v935_v43, %v859_v50  ;;  %v1056_v63 = vsel %vm488_vm1, %v1054_v42, %v1055_v45  ;;  %v333_v25 = vmul.f32 %v1961_v5, %v2153_v48 }
  0x92   : > { %v334_v26 = vmul.f32 %v1961_v5, %v2156_v51  ;;  %v981_v0 = vadd.f32 %v937_v56, %v860_v61  ;;  %v1058_v6 = vsel %vm488_vm1, %v1055_v45, %v1057_v57  ;;  %v335_v12 = vmul.f32 %v1961_v5, %v2158_v52 }
  0x93   : > { %v455_v3 = vmul.f32 %v1971_v7, %v2153_v48  ;;  %v1101_v60 = vadd.f32 %v1056_v63, %v980_v22  ;;  %v392_v1 = vrot.slane %v333_v25, 1  ;;  %v456_v18 = vmul.f32 %v1971_v7, %v2156_v51 }
  0x94   : > { %v393_v16 = vrot.slane %v334_v26, 1  ;;  %v1102_v19 = vadd.f32 %v1058_v6, %v981_v0  ;;  %v395_v20 = vrot.slane %v335_v12, 1  ;;  %v457_v36 = vmul.f32 %v1971_v7, %v2158_v52 }
  0x95   : > { %v514_v21 = vrot.slane %v455_v3, 2  ;;  %v515_v11 = vrot.slane %v456_v18, 2  ;;  %v572_v27 = vmul.f32 %v2145_v39, %v1973_v8  ;;  %v573_v48 = vmul.f32 %v2150_v44, %v1973_v8  ;;  %v267_v3 = vld [vmem:[%s1969_s13 + $0x6c] sm:$0xff]  }
  0x96   : > { %v394_v53 = vsel %vm366_vm0, %v392_v1, %v393_v16  ;;  %v1114_v17 = vpack.c.bf16 %v1102_v19, %v1101_v60  ;;  %v396_v29 = vsel %vm366_vm0, %v393_v16, %v395_v20  ;;  %v517_v51 = vrot.slane %v457_v36, 2 }
  0x97   : > { %v433_v58 = vadd.f32 %v394_v53, %v311_v46  ;;  %v434_v31 = vadd.f32 %v396_v29, %v312_v62  ;;  %v516_v32 = vsel %vm488_vm1, %v514_v21, %v515_v11  ;;  %v610_v52 = vmul.f32 %v2145_v39, %v1975_v9  ;;  %v2476_v53 = vld [vmem:[%s1969_s13 + $0x74] sm:$0x1]  ;;  %s2550_s13 = sand.u32 1, %s1819_s16  }
  0x98   : > { %v611_v33 = vmul.f32 %v2150_v44, %v1975_v9  ;;  %1206 = vmatmul.bf16.gmra.mxu1 %v1114_v17  ;;  %v518_v35 = vsel %vm488_vm1, %v515_v11, %v517_v51  ;;  %v612_v37 = vmul.f32 %v1975_v9, %v2160_v54  ;;  %v731_v30 = vmul.f32 %v2145_v39, %v1977_v10  ;;  %s1488_s14 = sshll.u32 %s2550_s13, 6  ;;  %s1325_s24 = scalar_lea.sflag [#allocation3], %s2550_s13 }
  0x99   : > { %v555_v23 = vadd.f32 %v516_v32, %v433_v58  ;;  %v556_v24 = vadd.f32 %v518_v35, %v434_v31  ;;  %v668_v28 = vrot.slane %v610_v52, 1  ;;  %v732_v38 = vmul.f32 %v2150_v44, %v1977_v10  ;;  %s2553_s23 = scalar_lea.vmem [#allocation2], %s1488_s14  ;;  %s1359_s14 = sadd.s32 %s1827_s18, %s1528_s12 }
  0x9a   : > { %v669_v34 = vrot.slane %v611_v33, 1  ;;  %v671_v42 = vrot.slane %v612_v37, 1  ;;  %v733_v50 = vmul.f32 %v1977_v10, %v2160_v54  ;;  %v789_v43 = vrot.slane %v731_v30, 2  ;;  %s1344_s10 = sshll.u32 %s2553_s23, 4  ;;  %s2568_s10 = int_to_ptr.vmem [resolvable:$true] %s1344_s10 }
  0x9b   : > { %v588_v41 = vadd.f32 %v572_v27, %v555_v23  ;;  %v589_v45 = vadd.f32 %v573_v48, %v556_v24  ;;  %v790_v61 = vrot.slane %v732_v38, 2  ;;  %v847_v39 = vmul.f32 %v1982_v14, %v2228_v49 }
  0x9c   : > { %v670_v46 = vsel %vm366_vm0, %v668_v28, %v669_v34  ;;  %v672_v56 = vsel %vm366_vm0, %v669_v34, %v671_v42  ;;  %v792_v62 = vrot.slane %v733_v50, 2  ;;  %v848_v44 = vmul.f32 %v1982_v14, %v2230_v55 }
  0x9d   : > { %v709_v57 = vadd.f32 %v670_v46, %v588_v41  ;;  %v710_v22 = vadd.f32 %v672_v56, %v589_v45  ;;  %v791_v63 = vsel %vm488_vm1, %v789_v43, %v790_v61  ;;  %v885_v54 = vmul.f32 %v1984_v15, %v2228_v49 }
  0x9e   : > { %v886_v25 = vmul.f32 %v1984_v15, %v2230_v55  ;;  %v793_v26 = vsel %vm488_vm1, %v790_v61, %v792_v62  ;;  %v887_v6 = vmul.f32 %v1984_v15, %v2232_v59  ;;  %v1006_v12 = vmul.f32 %v2050_v13, %v2228_v49 }
  0x9f   : > { %v830_v0 = vadd.f32 %v791_v63, %v709_v57  ;;  %v831_v60 = vadd.f32 %v793_v26, %v710_v22  ;;  %v943_v1 = vrot.slane %v885_v54, 1  ;;  %v1007_v18 = vmul.f32 %v2050_v13, %v2230_v55 }
  0xa0   : > { %v944_v16 = vrot.slane %v886_v25, 1  ;;  %v946_v20 = vrot.slane %v887_v6, 1  ;;  %v1008_v36 = vmul.f32 %v2050_v13, %v2232_v59  ;;  %v1064_v21 = vrot.slane %v1006_v12, 2 }
  0xa1   : > { %v863_v19 = vadd.f32 %v847_v39, %v830_v0  ;;  %v864_v11 = vadd.f32 %v848_v44, %v831_v60  ;;  %v1065_v48 = vrot.slane %v1007_v18, 2  ;;  %v2479_v17 = vunpack.c.l.bf16 %v267_v3 }
  0xa2   : > { %v945_v27 = vsel %vm366_vm0, %v943_v1, %v944_v16  ;;  %v947_v29 = vsel %vm366_vm0, %v944_v16, %v946_v20  ;;  %v1067_v51 = vrot.slane %v1008_v36, 2  ;;  %v2482_v31 = vunpack.c.h.bf16 %v267_v3 }
  0xa3   : > { %v984_v58 = vadd.f32 %v945_v27, %v863_v19  ;;  %v985_v32 = vadd.f32 %v947_v29, %v864_v11  ;;  %v1066_v52 = vsel %vm488_vm1, %v1064_v21, %v1065_v48  ;;  %v299_v13 = vunpack.c.l.bf16 %v2476_v53 }
  0xa4   : > { %v315_v33 = vmul.f32 %v1959_v4, %v2228_v49  ;;  %v1068_v35 = vsel %vm488_vm1, %v1065_v48, %v1067_v51  ;;  %v316_v37 = vmul.f32 %v1959_v4, %v2230_v55  ;;  %v339_v30 = vmul.f32 %v1961_v5, %v2228_v49 }
  0xa5   : > { %v1105_v23 = vadd.f32 %v1066_v52, %v984_v58  ;;  %v1106_v24 = vadd.f32 %v1068_v35, %v985_v32  ;;  %v340_v28 = vmul.f32 %v1961_v5, %v2230_v55  ;;  %v341_v34 = vmul.f32 %v1961_v5, %v2232_v59 }
  0xa6   : > { %v461_v38 = vmul.f32 %v1971_v7, %v2228_v49  ;;  %v402_v41 = vrot.slane %v339_v30, 1  ;;  %v462_v42 = vmul.f32 %v1971_v7, %v2230_v55  ;;  %v463_v4 = vmul.f32 %v1971_v7, %v2232_v59 }
  0xa7   : > { %v576_v50 = vmul.f32 %v2223_v40, %v1973_v8  ;;  %v1116_v43 = vpack.c.bf16 %v1106_v24, %v1105_v23  ;;  %v403_v45 = vrot.slane %v340_v28, 1  ;;  %v405_v46 = vrot.slane %v341_v34, 1 }
  0xa8   : > { %v524_v61 = vrot.slane %v461_v38, 2  ;;  %v525_v39 = vrot.slane %v462_v42, 2  ;;  %v527_v56 = vrot.slane %v463_v4, 2  ;;  %v577_v5 = vmul.f32 %v2226_v47, %v1973_v8 }
  0xa9   : > { %v616_v49 = vmul.f32 %v2223_v40, %v1975_v9  ;;  %1216 = vmatmul.bf16.gmra.mxu2 %v1116_v43  ;;  %v404_v55 = vsel %vm366_vm0, %v402_v41, %v403_v45  ;;  %v406_v7 = vsel %vm366_vm0, %v403_v45, %v405_v46  ;;  %v617_v59 = vmul.f32 %v2226_v47, %v1975_v9 }
  0xaa   : > { %v618_v57 = vmul.f32 %v1975_v9, %v2236_v2  ;;  %v437_v62 = vadd.f32 %v404_v55, %v315_v33  ;;  %v438_v44 = vadd.f32 %v406_v7, %v316_v37  ;;  %v526_v22 = vsel %vm488_vm1, %v524_v61, %v525_v39 }
  0xab   : > { %v528_v8 = vsel %vm488_vm1, %v525_v39, %v527_v56  ;;  %v678_v63 = vrot.slane %v616_v49, 1  ;;  %v679_v54 = vrot.slane %v617_v59, 1  ;;  %v737_v26 = vmul.f32 %v2223_v40, %v1977_v10 }
  0xac   : > { %v681_v25 = vrot.slane %v618_v57, 1  ;;  %v559_v0 = vadd.f32 %v526_v22, %v437_v62  ;;  %v560_v6 = vadd.f32 %v528_v8, %v438_v44  ;;  %v738_v12 = vmul.f32 %v2226_v47, %v1977_v10 }
  0xad   : > { %v739_v9 = vmul.f32 %v1977_v10, %v2236_v2  ;;  %v680_v3 = vsel %vm366_vm0, %v678_v63, %v679_v54  ;;  %v799_v1 = vrot.slane %v737_v26, 2  ;;  %v851_v16 = vmul.f32 %v1982_v14, %v2479_v17 }
  0xae   : > { %v682_v60 = vsel %vm366_vm0, %v679_v54, %v681_v25  ;;  %v592_v18 = vadd.f32 %v576_v50, %v559_v0  ;;  %v593_v19 = vadd.f32 %v577_v5, %v560_v6  ;;  %v800_v20 = vrot.slane %v738_v12, 2 }
  0xaf   : > { %v802_v40 = vrot.slane %v739_v9, 2  ;;  %v852_v36 = vmul.f32 %v1982_v14, %v2482_v31  ;;  %v891_v47 = vmul.f32 %v1984_v15, %v2479_v17  ;;  %v892_v10 = vmul.f32 %v1984_v15, %v2482_v31  ;;  %v1716_v14 = vld [vmem:[%s2629_s1 + $0x8] ss:$0 sm:$0xff] }
  0xb0   : > { %v893_v2 = vmul.f32 %v1984_v15, %v299_v13  ;;  %v713_v21 = vadd.f32 %v680_v3, %v592_v18  ;;  %v714_v11 = vadd.f32 %v682_v60, %v593_v19  ;;  %v801_v27 = vsel %vm488_vm1, %v799_v1, %v800_v20 }
  0xb1   : > { %v803_v48 = vsel %vm488_vm1, %v800_v20, %v802_v40  ;;  %v953_v29 = vrot.slane %v891_v47, 1  ;;  %v954_v58 = vrot.slane %v892_v10, 1  ;;  %v1012_v32 = vmul.f32 %v1716_v14, %v2479_v17 }
  0xb2   : > { %v956_v51 = vrot.slane %v893_v2, 1  ;;  %v834_v52 = vadd.f32 %v801_v27, %v713_v21  ;;  %v835_v33 = vadd.f32 %v803_v48, %v714_v11  ;;  %v1013_v35 = vmul.f32 %v1716_v14, %v2482_v31 }
  0xb3   : > { %v1014_v15 = vmul.f32 %v1716_v14, %v299_v13  ;;  %v955_v23 = vsel %vm366_vm0, %v953_v29, %v954_v58  ;;  %v1074_v30 = vrot.slane %v1012_v32, 2 }
  0xb4   : > { %v957_v37 = vsel %vm366_vm0, %v954_v58, %v956_v51  ;;  %v867_v24 = vadd.f32 %v851_v16, %v834_v52  ;;  %v868_v28 = vadd.f32 %v852_v36, %v835_v33  ;;  %v1075_v34 = vrot.slane %v1013_v35, 2 }
  0xb5   : > { %v1077_v38 = vrot.slane %v1014_v15, 2 }
  0xb6   : > { %v988_v41 = vadd.f32 %v955_v23, %v867_v24  ;;  %v989_v42 = vadd.f32 %v957_v37, %v868_v28  ;;  %v1076_v17 = vsel %vm488_vm1, %v1074_v30, %v1075_v34 }
  0xb7   : > { %v1078_v4 = vsel %vm488_vm1, %v1075_v34, %v1077_v38 }
  0xb8   : > { %v1109_v31 = vadd.f32 %v1076_v17, %v988_v41  ;;  %v1110_v50 = vadd.f32 %v1078_v4, %v989_v42  ;;  %v1192_v53 = vpop.f32.mrf.mxu0 }
  0xb9   : > { %v1254_v57 = vmul.f32 %v1192_v53, %v1192_v53 }
  0xba   : > { %v1118_v13 = vpack.c.bf16 %v1110_v50, %v1109_v31 }
  0xbc   : > { %1226 = vmatmul.bf16.gmra.mxu3 %v1118_v13 }
  0xc0   : > { %v1194_v43 = vpop.f32.mrf.mxu0 }
  0xc1   : > { %v1563_v45 = vpack.c.bf16 %v1194_v43, %v1192_v53  ;;  %v1255_v59 = vmul.f32 %v1194_v43, %v1194_v43  ;;  %v1232_v62 = vadd.f32 %v1194_v43, %v1192_v53 }
  0xc3   : > { %1564 = vst [vmem:[%s2553_s23] sm:$0xff] %v1563_v45   ;;  %v1270_v8 = vadd.f32 %v1255_v59, %v1254_v57 }
  0xcb   : > { %v1202_v46 = vpop.f32.mrf.mxu1 }
  0xcc   : > { %v1258_v3 = vmul.f32 %v1202_v46, %v1202_v46 }
  0xd3   : > { %v1204_v61 = vpop.f32.mrf.mxu1 }
  0xd4   : > { %v1573_v39 = vpack.c.bf16 %v1204_v61, %v1202_v46  ;;  %v1259_v18 = vmul.f32 %v1204_v61, %v1204_v61 }
  0xd6   : > { %1605 = vst [vmem:[%s2553_s23 + $0x10] sm:$0xff] %v1573_v39  }
  0xe4   : > { %v1212_v56 = vpop.f32.mrf.mxu2 }
  0xe5   : > { %v1262_v27 = vmul.f32 %v1212_v56, %v1212_v56 }
  0xec   : > { %v1214_v5 = vpop.f32.mrf.mxu2 }
  0xed   : > { %v1583_v49 = vpack.c.bf16 %v1214_v5, %v1212_v56  ;;  %v1263_v58 = vmul.f32 %v1214_v5, %v1214_v5 }
  0xef   : > { %1607 = vst [vmem:[%s2553_s23 + $0x20] sm:$0xff] %v1583_v49  }
  0xf8   : > { %v1222_v7 = vpop.f32.mrf.mxu3 }
  0xf9   : > { %v1266_v34 = vmul.f32 %v1222_v7, %v1222_v7 }
 0x100   : > { %v1224_v6 = vpop.f32.mrf.mxu3 }
 0x101   : > { %v1593_v9 = vpack.c.bf16 %v1224_v6, %v1222_v7  ;;  %v1267_v17 = vmul.f32 %v1224_v6, %v1224_v6 }
 0x103   : > { %v1197_v55 = vpop.f32.mrf.mxu0  ;;  %1609 = vst [vmem:[%s2553_s23 + $0x30] sm:$0xff] %v1593_v9  }
 0x104   : > { %v1256_v44 = vmul.f32 %v1197_v55, %v1197_v55  ;;  %v1233_v63 = vadd.f32 %v1232_v62, %v1197_v55 }
 0x106   : > { %v1271_v26 = vadd.f32 %v1270_v8, %v1256_v44 }
 0x10b   : > { %v1199_v22 = vpop.f32.mrf.mxu0 }
 0x10c   : > { %v1257_v54 = vmul.f32 %v1199_v22, %v1199_v22  ;;  %v1568_v25 = vpack.c.bf16 %v1199_v22, %v1197_v55  ;;  %v1234_v0 = vadd.f32 %v1233_v63, %v1199_v22 }
 0x10e   : > { %1604 = vst [vmem:[%s2553_s23 + $0x8] sm:$0xff] %v1568_v25   ;;  %v1272_v12 = vadd.f32 %v1271_v26, %v1257_v54  ;;  %v1235_v60 = vadd.f32 %v1234_v0, %v1202_v46 }
 0x110   : > { %v1273_v1 = vadd.f32 %v1272_v12, %v1258_v3  ;;  %v1236_v19 = vadd.f32 %v1235_v60, %v1204_v61 }
 0x112   : > { %v1274_v20 = vadd.f32 %v1273_v1, %v1259_v18 }
 0x115   : > { %v1207_v16 = vpop.f32.mrf.mxu1 }
 0x116   : > { %v1260_v40 = vmul.f32 %v1207_v16, %v1207_v16  ;;  %v1237_v36 = vadd.f32 %v1236_v19, %v1207_v16 }
 0x118   : > { %v1275_v47 = vadd.f32 %v1274_v20, %v1260_v40 }
 0x11d   : > { %v1209_v10 = vpop.f32.mrf.mxu1 }
 0x11e   : > { %v1238_v2 = vadd.f32 %v1237_v36, %v1209_v10  ;;  %v1261_v21 = vmul.f32 %v1209_v10, %v1209_v10  ;;  %v1578_v11 = vpack.c.bf16 %v1209_v10, %v1207_v16 }
 0x120   : > { %v1239_v48 = vadd.f32 %v1238_v2, %v1212_v56  ;;  %v1276_v29 = vadd.f32 %v1275_v47, %v1261_v21  ;;  %1606 = vst [vmem:[%s2553_s23 + $0x18] sm:$0xff] %v1578_v11  }
 0x122   : > { %v1277_v51 = vadd.f32 %v1276_v29, %v1262_v27  ;;  %v1240_v14 = vadd.f32 %v1239_v48, %v1214_v5 }
 0x124   : > { %v1278_v32 = vadd.f32 %v1277_v51, %v1263_v58 }
 0x12c   : > { %v1217_v52 = vpop.f32.mrf.mxu2 }
 0x12d   : > { %v1241_v33 = vadd.f32 %v1240_v14, %v1217_v52  ;;  %v1264_v35 = vmul.f32 %v1217_v52, %v1217_v52 }
 0x12f   : > { %v1279_v37 = vadd.f32 %v1278_v32, %v1264_v35 }
 0x134   : > { %v1219_v15 = vpop.f32.mrf.mxu2 }
 0x135   : > { %v1588_v23 = vpack.c.bf16 %v1219_v15, %v1217_v52  ;;  %v1242_v30 = vadd.f32 %v1241_v33, %v1219_v15  ;;  %v1265_v24 = vmul.f32 %v1219_v15, %v1219_v15 }
 0x137   : > { %1608 = vst [vmem:[%s2553_s23 + $0x28] sm:$0xff] %v1588_v23   ;;  %v1280_v28 = vadd.f32 %v1279_v37, %v1265_v24  ;;  %v1243_v38 = vadd.f32 %v1242_v30, %v1222_v7 }
 0x139   : > { %v1281_v41 = vadd.f32 %v1280_v28, %v1266_v34  ;;  %v1244_v4 = vadd.f32 %v1243_v38, %v1224_v6 }
 0x13b   : > { %v1282_v31 = vadd.f32 %v1281_v41, %v1267_v17 }
 0x13f   : > { %v1227_v42 = vpop.f32.mrf.mxu3 }
 0x140   : > { %v1245_v50 = vadd.f32 %v1244_v4, %v1227_v42  ;;  %v1268_v53 = vmul.f32 %v1227_v42, %v1227_v42 }
 0x142   : > { %v1283_v13 = vadd.f32 %v1282_v31, %v1268_v53 }
 0x147   : > { %v1229_v43 = vpop.f32.mrf.mxu3 }
 0x148   : > { %v1246_v45 = vadd.f32 %v1245_v50, %v1229_v43  ;;  %v1269_v46 = vmul.f32 %v1229_v43, %v1229_v43  ;;  %v1598_v61 = vpack.c.bf16 %v1229_v43, %v1227_v42 }
 0x14a   : > { %v1247_v39 = vrot.slane %v1246_v45, 4  ;;  %v1284_v56 = vadd.f32 %v1283_v13, %v1269_v46  ;;  %1610 = vst [vmem:[%s2553_s23 + $0x38] sm:$0xff] %v1598_v61  }
 0x14b   : > { %1744 = shalt.err (!%p1741_p7)
}
 0x14c   : > { %s1845_s18 = smov 64   ;;  %s1846_s23 = smov 4   ;;  %v1248_v5 = vadd.f32 %v1247_v39, %v1246_v45  ;;  %v1285_v49 = vrot.slane %v1284_v56, 4 }
 0x14d   : > { %1637 = dma.vmem_to_hbm [thread:$0]  (%p1923_p3), %s2568_s10, 1024, %s1347_s11, %s1325_s24, %s1845_s18, %s1845_s18, %s1846_s23  }
 0x14e   : > { %s1489_s12 = sshll.u32 %s2550_s13, 1  ;;  %s1529_s5 = sshll.u32 %s1359_s14, 1  ;;  %v1249_v55 = vrot.slane %v1248_v5, 2  ;;  %v1286_v7 = vadd.f32 %v1285_v49, %v1284_v56 }
 0x14f   : > { %s1361_s6 = scalar_lea.hbm %s2632_s4, %s1529_s5  ;;  %s227_s19 = scalar_lea.vmem [#allocation4], %s1489_s12 }
 0x150   : > { %v1250_v59 = vadd.f32 %v1249_v55, %v1248_v5  ;;  %v1287_v57 = vrot.slane %v1286_v7, 2  ;;  %s1363_s8 = sshll.u32 %s227_s19, 4  ;;  %s1365_s9 = sshll.u32 %s1361_s6, 4  ;;  %s1364_s8 = int_to_ptr.vmem [resolvable:$true] %s1363_s8  ;;  %s1366_s9 = int_to_ptr.hbm [resolvable:$true] %s1365_s9 }
 0x151   : > { %s1330_s10 = scalar_lea.sflag [#allocation5], %s2550_s13  ;;  %s1759_s11 = sshra.s32 %s1366_s9, 4  ;;  %s1760_s11 = int_to_ptr.hbm [resolvable:$true] %s1759_s11 }
 0x152   : > { %v1251_v62 = vrot.slane %v1250_v59, 1  ;;  %v1288_v44 = vadd.f32 %v1287_v57, %v1286_v7  ;;  %s1761_s14 = scalar_lea.hbm %s1760_s11, 2  ;;  %s1765_s23 = scalar_lea.hbm %s2632_s4, 8 }
 0x153   : > { %p1762_p9 = scmp.ne.s32.totalorder %s1760_s11, %s1761_s14  ;;  %p1766_p12 = scmp.lt.s32.totalorder %s1760_s11, %s2632_s4 }
 0x154   : > { %v1252_v22 = vadd.f32 %v1251_v62, %v1250_v59  ;;  %v1289_v8 = vrot.slane %v1288_v44, 1  ;;  %p1767_p13 = scmp.lt.s32.totalorder %s1765_s23, %s1761_s14 }
 0x155   : > { %p1763_p10 = pnand %p1762_p9, %p1923_p3 }
 0x156   : > { %1253 = vst [vmem:[%s227_s19] sm:$0x1] %v1252_v22  ;;  %v1290_v63 = vadd.f32 %v1289_v8, %v1288_v44  ;;  %p1768_p0 = por %p1767_p13, %p1766_p12 }
 0x157   : > { %p1764_p11 = pneg %p1763_p10 }
 0x158   : > { %1291 = vst [vmem:[%s227_s19 + $0x1] sm:$0x1] %v1290_v63 }
 0x159   : > { %p1769_p1 = pnand %p1768_p0, %p1764_p11 }
 0x15b   : > { %1772 = shalt.err (!%p1769_p1)
}
 0x15c   : > { %1638 = dma.vmem_to_hbm [thread:$0]  (%p1923_p3), %s1364_s8, 32, %s1366_s9, %s1330_s10  }
 0x15d PF: > { %p1648_p2 = scmp.ge.s32.totalorder %s1843_s22, 2  ;;  %s1377_s13 = sand.u32 1, %s1815_s15  }
 0x15e   : > { %s1378_s27 = scalar_lea.sflag [#allocation3], %s1377_s13 }
 0x15f   : > { %p1642_p4 = pnand %p1648_p2, %p1932_p8 }
 0x161   : > { %p1643_p5 = pneg %p1642_p4 }
 0x163   : > { %1806 = dma.done.wait (%p1643_p5), %s1378_s27, 1024  }
 0x164   : > { %1808 = vsyncadd (%p1643_p5), %s1378_s27, 4294966272  ;;  %s1388_s30 = scalar_lea.sflag [#allocation5], %s1377_s13 }
 0x165   : > { %1810 = dma.done.wait (%p1643_p5), %s1388_s30, 32  }
 0x166   : > { %1812 = vsyncadd (%p1643_p5), %s1388_s30, 4294967264  ;;  %s21_s22 = sadd.s32 1, %s1843_s22   ;;  %s2635_s15 = smov %s1819_s16 }
 0x167   : > { %p18_p6 = scmp.ge.s32.totalorder %s21_s22, 6   ;;  %s2636_s16 = smov %s1823_s17 }
 0x168   : > { %s2637_s17 = smov %s1941_s7  ;;  %s2638_s18 = smov %s1835_s20 }
 0x169   : > { %s2639_s19 = smov %s1839_s21  ;;  %s2640_s20 = smov %s2643_s25 }
 0x16a   : > { %s2641_s21 = smov %s2647_s26  ;;  %20 = sbr.rel (!%p18_p6) target bundleno = 7 (0x7), region = 84 }
 0x16f   :  { %1394 = vsyncpa [#allocation3], 1 }
 0x170   :  { %1396 = vsyncpa [#allocation3 + $0x1], 1 }
 0x171   :  { %1397 = vsyncpa [#allocation5], 1 }
 0x172   :  { %1399 = vsyncpa [#allocation5 + $0x1], 1 }

</bundles_post_ra>
